<compile_context>
chip_gen: v7x
topology: tpu7x:2x2x1
jax: 0.10.0
libtpu: 0.0.40
codegen_flags: <defaults>
</compile_context>

<pallas_src>
import functools
import math

import jax
import jax.numpy as jnp
import numpy as np
from jax.experimental import pallas as pl
from jax.experimental.pallas import tpu as pltpu


def _bn_relu(h, gamma, beta, eps=1e-5):
    # BatchNorm1d (training mode: biased batch stats over rows) + ReLU.
    mean = jnp.mean(h, axis=0, keepdims=True)
    var = jnp.mean(jnp.square(h - mean), axis=0, keepdims=True)
    hn = (h - mean) * jax.lax.rsqrt(var + eps)
    return jnp.maximum(hn * gamma + beta, 0.0)


def _pge_fused_kernel(x_ref, w1_ref, b1_ref, g1_ref, be1_ref,
                      w2_ref, b2_ref, g2_ref, be2_ref, w3_ref, b3_ref,
                      out_ref, *, nhid):
    """Graph-0 edge MLP + symmetrize + sigmoid + zero-diag -> (N, N) adjacency."""
    n = x_ref.shape[0]
    x = x_ref[...].astype(jnp.float32)                                   # (N, F)

    # Fused first layer: one (F, 2H) matmul, then static lane slices.
    y = jnp.dot(x, w1_ref[...], preferred_element_type=jnp.float32)      # (N, 2H)
    a = y[:, :nhid] + b1_ref[...]                                        # (N, H)
    b = y[:, nhid:]                                                      # (N, H)

    # concat(x[e0], x[e1]) @ W1 + b1 : edge row r*N + c  ==  a[r] + b[c].
    h = (a[:, None, :] + b[None, :, :]).reshape(n * n, nhid)             # (N*N, H)
    h = _bn_relu(h, g1_ref[...], be1_ref[...])

    h = jnp.dot(h, w2_ref[...], preferred_element_type=jnp.float32) + b2_ref[...]
    h = _bn_relu(h, g2_ref[...], be2_ref[...])

    # Last Linear (H -> 1) as a lane reduction so the logits land directly in (N, N).
    logits = jnp.sum(h.reshape(n, n, nhid) * w3_ref[...][None, :, :], axis=-1)
    logits = logits + b3_ref[...]                                        # (N, N)

    # Post-processing fused in: symmetrize, sigmoid, zero the diagonal.
    sym = (logits + logits.T) * 0.5
    sig = jax.nn.sigmoid(sym)
    r = jax.lax.broadcasted_iota(jnp.int32, (n, n), 0)
    c = jax.lax.broadcasted_iota(jnp.int32, (n, n), 1)
    out_ref[...] = jnp.where(r == c, 0.0, sig).astype(out_ref.dtype)


_PARAM_ORDER = ("w1", "b1", "g1", "be1", "w2", "b2", "g2", "be2", "w3r", "b3")


def pge_forward(x, params):
    n_syn, nnodes, nfeat = x.shape
    nhid = params["b1"].shape[-1]

    # Host-side (one-time) param repacking: fuse W1a/W1b along out-features, and
    # lay out w3 as a (1, H) row so the kernel's final reduction is a lane broadcast.
    kparams = dict(
        w1=jnp.concatenate([params["w1a"], params["w1b"]], axis=1),      # (F, 2H)
        b1=params["b1"], g1=params["g1"], be1=params["be1"],
        w2=params["w2"], b2=params["b2"], g2=params["g2"], be2=params["be2"],
        w3r=params["w3"].reshape(1, nhid),                               # (1, H)
        b3=params["b3"],                                                 # (1, 1)
    )

    # Only graph 0 ever contributes to the reference output (adj_ = adj[0]).
    x0 = x[0]                                                            # (N, F)

    def full_spec(arr):
        nd = arr.ndim
        return pl.BlockSpec(arr.shape, lambda i, _nd=nd: (0,) * _nd)

    in_specs = [full_spec(x0)] + [full_spec(kparams[k]) for k in _PARAM_ORDER]

    adj0 = pl.pallas_call(
        functools.partial(_pge_fused_kernel, nhid=nhid),
        out_shape=jax.ShapeDtypeStruct((nnodes, nnodes), jnp.float32),
        grid_spec=pltpu.PrefetchScalarGridSpec(
            num_scalar_prefetch=0,
            grid=(1,),
            in_specs=in_specs,
            out_specs=pl.BlockSpec((nnodes, nnodes), lambda i: (0, 0)),
        ),
        compiler_params=pltpu.CompilerParams(dimension_semantics=("arbitrary",)),
    )(x0, *(kparams[k] for k in _PARAM_ORDER))

    # Reference output is n_syn copies of graph 0's adjacency: plain XLA broadcast.
    return jnp.broadcast_to(adj0[None], (n_syn, nnodes, nnodes))

    # TODO(synk): for nnodes >~ 512 the (N*N, H) activation must be tiled over edge
    # rows (with two-pass BN stats) to stay within VMEM; unnecessary at these sizes.


def init_params(nfeat, nhid, key):
    """Deterministic PyTorch-style init (U(-1/sqrt(fan_in), 1/sqrt(fan_in)))."""
    keys = jax.random.split(key, 3)

    def linear(k, fan_in, fan_out):
        bound = 1.0 / math.sqrt(fan_in)
        kw, kb = jax.random.split(k)
        w = jax.random.uniform(kw, (fan_in, fan_out), jnp.float32, -bound, bound)
        b = jax.random.uniform(kb, (1, fan_out), jnp.float32, -bound, bound)
        return w, b

    w1, b1 = linear(keys[0], 2 * nfeat, nhid)
    w2, b2 = linear(keys[1], nhid, nhid)
    w3, b3 = linear(keys[2], nhid, 1)
    ones = jnp.ones((1, nhid), jnp.float32)
    zeros = jnp.zeros((1, nhid), jnp.float32)
    return dict(
        w1a=w1[:nfeat], w1b=w1[nfeat:], b1=b1, g1=ones, be1=zeros,
        w2=w2, b2=b2, g2=ones, be2=zeros,
        w3=w3, b3=b3,
    )


def pge_reference(x, params):
    """Pure-JAX replica of the PyTorch forward (including the adj[0] indexing quirk)."""
    n_syn, nnodes, _ = x.shape
    e0 = jnp.repeat(jnp.arange(nnodes), nnodes)
    e1 = jnp.tile(jnp.arange(nnodes), nnodes)
    w1 = jnp.concatenate([params["w1a"], params["w1b"]], axis=0)
    outs = []
    for i in range(n_syn):
        xi = x[i]
        emb = jnp.concatenate([xi[e0], xi[e1]], axis=1)
        h = emb @ w1 + params["b1"]
        h = _bn_relu(h, params["g1"], params["be1"])
        h = h @ params["w2"] + params["b2"]
        h = _bn_relu(h, params["g2"], params["be2"])
        outs.append((h @ params["w3"] + params["b3"])[None])
    logits = jnp.concatenate(outs, 0)                       # (n_syn, N*N, 1)
    adj = logits.reshape(n_syn, nnodes, nnodes)
    adj = (adj + jnp.transpose(adj, (0, 2, 1))) * 0.5
    adj = jax.nn.sigmoid(adj)
    adj0 = adj[0]
    adj0 = adj0 - jnp.diag(jnp.diag(adj0))
    return jnp.broadcast_to(adj0[None], (n_syn, nnodes, nnodes))


if __name__ == "__main__":
    n_syn, nnodes, nfeat, nhid = 2, 16, 8, 32   # nlayers = 3 (Linear, Linear, Linear->1)
    key = jax.random.PRNGKey(0)
    kx, kp = jax.random.split(key)
    x = jax.random.normal(kx, (n_syn, nnodes, nfeat), jnp.float32)
    params = init_params(nfeat, nhid, kp)

    out = jax.block_until_ready(pge_forward(x, params))
    ref = jax.block_until_ready(pge_reference(x, params))

    assert out.shape == (n_syn, nnodes, nnodes)
    np.testing.assert_allclose(np.asarray(out), np.asarray(ref), atol=2e-2, rtol=2e-2)
    print("KERNEL_OK")
</pallas_src>

<mosaic_0001>
module attributes {stable_mosaic.version = 11 : i64} {
  func.func @_pge_fused_kernel(%arg0: i32, %arg1: memref<16x8xf32, #tpu.memory_space<vmem>>, %arg2: memref<8x64xf32, #tpu.memory_space<vmem>>, %arg3: memref<1x32xf32, #tpu.memory_space<vmem>>, %arg4: memref<1x32xf32, #tpu.memory_space<vmem>>, %arg5: memref<1x32xf32, #tpu.memory_space<vmem>>, %arg6: memref<32x32xf32, #tpu.memory_space<vmem>>, %arg7: memref<1x32xf32, #tpu.memory_space<vmem>>, %arg8: memref<1x32xf32, #tpu.memory_space<vmem>>, %arg9: memref<1x32xf32, #tpu.memory_space<vmem>>, %arg10: memref<1x32xf32, #tpu.memory_space<vmem>>, %arg11: memref<1x1xf32, #tpu.memory_space<vmem>>, %arg12: memref<16x16xf32, #tpu.memory_space<vmem>>) attributes {dimension_semantics = [#tpu.dimension_semantics<arbitrary>], iteration_bounds = array<i64: 1>, scalar_prefetch = 0 : i64, scratch_operands = 0 : i64, tpu.core_type = #tpu.core_type<tc>, window_params = [{pipeline_mode = #tpu.pipeline_mode<synchronous>, transform_indices = @transform_0, window_bounds = array<i64: 16, 8>}, {pipeline_mode = #tpu.pipeline_mode<synchronous>, transform_indices = @transform_1, window_bounds = array<i64: 8, 64>}, {pipeline_mode = #tpu.pipeline_mode<synchronous>, transform_indices = @transform_2, window_bounds = array<i64: 1, 32>}, {pipeline_mode = #tpu.pipeline_mode<synchronous>, transform_indices = @transform_3, window_bounds = array<i64: 1, 32>}, {pipeline_mode = #tpu.pipeline_mode<synchronous>, transform_indices = @transform_4, window_bounds = array<i64: 1, 32>}, {pipeline_mode = #tpu.pipeline_mode<synchronous>, transform_indices = @transform_5, window_bounds = array<i64: 32, 32>}, {pipeline_mode = #tpu.pipeline_mode<synchronous>, transform_indices = @transform_6, window_bounds = array<i64: 1, 32>}, {pipeline_mode = #tpu.pipeline_mode<synchronous>, transform_indices = @transform_7, window_bounds = array<i64: 1, 32>}, {pipeline_mode = #tpu.pipeline_mode<synchronous>, transform_indices = @transform_8, window_bounds = array<i64: 1, 32>}, {pipeline_mode = #tpu.pipeline_mode<synchronous>, transform_indices = @transform_9, window_bounds = array<i64: 1, 32>}, {pipeline_mode = #tpu.pipeline_mode<synchronous>, transform_indices = @transform_10, window_bounds = array<i64: 1, 1>}, {pipeline_mode = #tpu.pipeline_mode<synchronous>, transform_indices = @transform_11, window_bounds = array<i64: 16, 16>}]} {
    %c0 = arith.constant 0 : index
    %c0_0 = arith.constant 0 : index
    %0 = vector.load %arg1[%c0, %c0_0] : memref<16x8xf32, #tpu.memory_space<vmem>>, vector<16x8xf32>
    %c0_1 = arith.constant 0 : index
    %c0_2 = arith.constant 0 : index
    %1 = vector.load %arg2[%c0_1, %c0_2] : memref<8x64xf32, #tpu.memory_space<vmem>>, vector<8x64xf32>
    %cst = arith.constant dense<0.000000e+00> : vector<16x64xf32>
    %2 = tpu.matmul %0, %1, %cst {dimension_numbers = #tpu.dot_dimension_numbers<[1], [0], [0], [1], [0, 0, 1, 1], [], []>} : vector<16x8xf32>, vector<8x64xf32>, vector<16x64xf32> -> vector<16x64xf32>
    %3 = vector.extract_strided_slice %2 {offsets = [0, 0], sizes = [16, 32], strides = [1, 1]} : vector<16x64xf32> to vector<16x32xf32>
    %c0_3 = arith.constant 0 : index
    %c0_4 = arith.constant 0 : index
    %4 = vector.load %arg3[%c0_3, %c0_4] : memref<1x32xf32, #tpu.memory_space<vmem>>, vector<1x32xf32>
    %5 = vector.broadcast %4 : vector<1x32xf32> to vector<16x32xf32>
    %6 = arith.addf %3, %5 : vector<16x32xf32>
    %7 = vector.extract_strided_slice %2 {offsets = [0, 32], sizes = [16, 32], strides = [1, 1]} : vector<16x64xf32> to vector<16x32xf32>
    %8 = vector.shape_cast %6 : vector<16x32xf32> to vector<16x1x32xf32>
    %9 = vector.shape_cast %7 : vector<16x32xf32> to vector<1x16x32xf32>
    %10 = vector.broadcast %8 : vector<16x1x32xf32> to vector<16x16x32xf32>
    %11 = vector.broadcast %9 : vector<1x16x32xf32> to vector<16x16x32xf32>
    %12 = arith.addf %10, %11 : vector<16x16x32xf32>
    %13 = vector.shape_cast %12 : vector<16x16x32xf32> to vector<256x32xf32>
    %c0_5 = arith.constant 0 : index
    %c0_6 = arith.constant 0 : index
    %14 = vector.load %arg4[%c0_5, %c0_6] : memref<1x32xf32, #tpu.memory_space<vmem>>, vector<1x32xf32>
    %c0_7 = arith.constant 0 : index
    %c0_8 = arith.constant 0 : index
    %15 = vector.load %arg5[%c0_7, %c0_8] : memref<1x32xf32, #tpu.memory_space<vmem>>, vector<1x32xf32>
    %cst_9 = arith.constant dense<0.000000e+00> : vector<32xf32>
    %16 = vector.multi_reduction <add>, %13, %cst_9 [0] : vector<256x32xf32> to vector<32xf32>
    %17 = vector.shape_cast %16 : vector<32xf32> to vector<1x32xf32>
    %cst_10 = arith.constant 2.560000e+02 : f32
    %18 = vector.broadcast %cst_10 : f32 to vector<1x32xf32>
    %19 = arith.divf %17, %18 : vector<1x32xf32>
    %20 = vector.broadcast %19 : vector<1x32xf32> to vector<256x32xf32>
    %21 = arith.subf %13, %20 : vector<256x32xf32>
    %22 = arith.mulf %21, %21 : vector<256x32xf32>
    %cst_11 = arith.constant dense<0.000000e+00> : vector<32xf32>
    %23 = vector.multi_reduction <add>, %22, %cst_11 [0] : vector<256x32xf32> to vector<32xf32>
    %24 = vector.shape_cast %23 : vector<32xf32> to vector<1x32xf32>
    %cst_12 = arith.constant 2.560000e+02 : f32
    %25 = vector.broadcast %cst_12 : f32 to vector<1x32xf32>
    %26 = arith.divf %24, %25 : vector<1x32xf32>
    %27 = vector.broadcast %19 : vector<1x32xf32> to vector<256x32xf32>
    %28 = arith.subf %13, %27 : vector<256x32xf32>
    %cst_13 = arith.constant 9.99999974E-6 : f32
    %29 = vector.broadcast %cst_13 : f32 to vector<1x32xf32>
    %30 = arith.addf %26, %29 : vector<1x32xf32>
    %31 = math.rsqrt %30 : vector<1x32xf32>
    %32 = vector.broadcast %31 : vector<1x32xf32> to vector<256x32xf32>
    %33 = arith.mulf %28, %32 : vector<256x32xf32>
    %34 = vector.broadcast %14 : vector<1x32xf32> to vector<256x32xf32>
    %35 = arith.mulf %33, %34 : vector<256x32xf32>
    %36 = vector.broadcast %15 : vector<1x32xf32> to vector<256x32xf32>
    %37 = arith.addf %35, %36 : vector<256x32xf32>
    %cst_14 = arith.constant 0.000000e+00 : f32
    %38 = vector.broadcast %cst_14 : f32 to vector<256x32xf32>
    %39 = arith.maximumf %37, %38 : vector<256x32xf32>
    %c0_15 = arith.constant 0 : index
    %c0_16 = arith.constant 0 : index
    %40 = vector.load %arg6[%c0_15, %c0_16] : memref<32x32xf32, #tpu.memory_space<vmem>>, vector<32x32xf32>
    %cst_17 = arith.constant dense<0.000000e+00> : vector<256x32xf32>
    %41 = tpu.matmul %39, %40, %cst_17 {dimension_numbers = #tpu.dot_dimension_numbers<[1], [0], [0], [1], [0, 0, 1, 1], [], []>} : vector<256x32xf32>, vector<32x32xf32>, vector<256x32xf32> -> vector<256x32xf32>
    %c0_18 = arith.constant 0 : index
    %c0_19 = arith.constant 0 : index
    %42 = vector.load %arg7[%c0_18, %c0_19] : memref<1x32xf32, #tpu.memory_space<vmem>>, vector<1x32xf32>
    %43 = vector.broadcast %42 : vector<1x32xf32> to vector<256x32xf32>
    %44 = arith.addf %41, %43 : vector<256x32xf32>
    %c0_20 = arith.constant 0 : index
    %c0_21 = arith.constant 0 : index
    %45 = vector.load %arg8[%c0_20, %c0_21] : memref<1x32xf32, #tpu.memory_space<vmem>>, vector<1x32xf32>
    %c0_22 = arith.constant 0 : index
    %c0_23 = arith.constant 0 : index
    %46 = vector.load %arg9[%c0_22, %c0_23] : memref<1x32xf32, #tpu.memory_space<vmem>>, vector<1x32xf32>
    %cst_24 = arith.constant dense<0.000000e+00> : vector<32xf32>
    %47 = vector.multi_reduction <add>, %44, %cst_24 [0] : vector<256x32xf32> to vector<32xf32>
    %48 = vector.shape_cast %47 : vector<32xf32> to vector<1x32xf32>
    %cst_25 = arith.constant 2.560000e+02 : f32
    %49 = vector.broadcast %cst_25 : f32 to vector<1x32xf32>
    %50 = arith.divf %48, %49 : vector<1x32xf32>
    %51 = vector.broadcast %50 : vector<1x32xf32> to vector<256x32xf32>
    %52 = arith.subf %44, %51 : vector<256x32xf32>
    %53 = arith.mulf %52, %52 : vector<256x32xf32>
    %cst_26 = arith.constant dense<0.000000e+00> : vector<32xf32>
    %54 = vector.multi_reduction <add>, %53, %cst_26 [0] : vector<256x32xf32> to vector<32xf32>
    %55 = vector.shape_cast %54 : vector<32xf32> to vector<1x32xf32>
    %cst_27 = arith.constant 2.560000e+02 : f32
    %56 = vector.broadcast %cst_27 : f32 to vector<1x32xf32>
    %57 = arith.divf %55, %56 : vector<1x32xf32>
    %58 = vector.broadcast %50 : vector<1x32xf32> to vector<256x32xf32>
    %59 = arith.subf %44, %58 : vector<256x32xf32>
    %cst_28 = arith.constant 9.99999974E-6 : f32
    %60 = vector.broadcast %cst_28 : f32 to vector<1x32xf32>
    %61 = arith.addf %57, %60 : vector<1x32xf32>
    %62 = math.rsqrt %61 : vector<1x32xf32>
    %63 = vector.broadcast %62 : vector<1x32xf32> to vector<256x32xf32>
    %64 = arith.mulf %59, %63 : vector<256x32xf32>
    %65 = vector.broadcast %45 : vector<1x32xf32> to vector<256x32xf32>
    %66 = arith.mulf %64, %65 : vector<256x32xf32>
    %67 = vector.broadcast %46 : vector<1x32xf32> to vector<256x32xf32>
    %68 = arith.addf %66, %67 : vector<256x32xf32>
    %cst_29 = arith.constant 0.000000e+00 : f32
    %69 = vector.broadcast %cst_29 : f32 to vector<256x32xf32>
    %70 = arith.maximumf %68, %69 : vector<256x32xf32>
    %71 = vector.shape_cast %70 : vector<256x32xf32> to vector<16x16x32xf32>
    %c0_30 = arith.constant 0 : index
    %c0_31 = arith.constant 0 : index
    %72 = vector.load %arg10[%c0_30, %c0_31] : memref<1x32xf32, #tpu.memory_space<vmem>>, vector<1x32xf32>
    %73 = vector.shape_cast %72 : vector<1x32xf32> to vector<1x1x32xf32>
    %74 = vector.broadcast %73 : vector<1x1x32xf32> to vector<16x16x32xf32>
    %75 = arith.mulf %71, %74 : vector<16x16x32xf32>
    %cst_32 = arith.constant dense<0.000000e+00> : vector<16x16xf32>
    %76 = vector.multi_reduction <add>, %75, %cst_32 [2] : vector<16x16x32xf32> to vector<16x16xf32>
    %c0_33 = arith.constant 0 : index
    %c0_34 = arith.constant 0 : index
    %77 = vector.load %arg11[%c0_33, %c0_34] : memref<1x1xf32, #tpu.memory_space<vmem>>, vector<1x1xf32>
    %78 = vector.broadcast %77 : vector<1x1xf32> to vector<16x16xf32>
    %79 = arith.addf %76, %78 : vector<16x16xf32>
    %80 = tpu.transpose %79, [1, 0] : vector<16x16xf32> -> vector<16x16xf32>
    %81 = arith.addf %79, %80 : vector<16x16xf32>
    %cst_35 = arith.constant 5.000000e-01 : f32
    %82 = vector.broadcast %cst_35 : f32 to vector<16x16xf32>
    %83 = arith.mulf %81, %82 : vector<16x16xf32>
    %84 = arith.negf %83 : vector<16x16xf32>
    %85 = math.exp %84 : vector<16x16xf32>
    %cst_36 = arith.constant 1.000000e+00 : f32
    %86 = vector.broadcast %cst_36 : f32 to vector<16x16xf32>
    %87 = arith.addf %86, %85 : vector<16x16xf32>
    %88 = arith.divf %86, %87 : vector<16x16xf32>
    %89 = tpu.iota {dimensions = array<i32: 0>} : vector<16x16xi32>
    %90 = tpu.iota {dimensions = array<i32: 1>} : vector<16x16xi32>
    %91 = arith.cmpi eq, %89, %90 : vector<16x16xi32>
    %cst_37 = arith.constant 0.000000e+00 : f32
    %92 = vector.broadcast %cst_37 : f32 to vector<16x16xf32>
    %93 = arith.select %91, %92, %88 : vector<16x16xi1>, vector<16x16xf32>
    %c0_38 = arith.constant 0 : index
    %c0_39 = arith.constant 0 : index
    %94 = vector.load %arg12[%c0_38, %c0_39] : memref<16x16xf32, #tpu.memory_space<vmem>>, vector<16x16xf32>
    tpu.vector_store %arg12[%c0_38, %c0_39], %93 {strides = array<i32>} : memref<16x16xf32, #tpu.memory_space<vmem>>, vector<16x16xf32>,
    return
  }
  func.func @transform_0(%arg0: i32) -> (i32, i32) {
    %c0_i32 = arith.constant 0 : i32
    %c0_i32_0 = arith.constant 0 : i32
    %c0_i32_1 = arith.constant 0 : i32
    return %c0_i32, %c0_i32_0 : i32, i32
  }
  func.func @transform_1(%arg0: i32) -> (i32, i32) {
    %c0_i32 = arith.constant 0 : i32
    %c0_i32_0 = arith.constant 0 : i32
    %c0_i32_1 = arith.constant 0 : i32
    return %c0_i32, %c0_i32_0 : i32, i32
  }
  func.func @transform_2(%arg0: i32) -> (i32, i32) {
    %c0_i32 = arith.constant 0 : i32
    %c0_i32_0 = arith.constant 0 : i32
    %c0_i32_1 = arith.constant 0 : i32
    return %c0_i32, %c0_i32_0 : i32, i32
  }
  func.func @transform_3(%arg0: i32) -> (i32, i32) {
    %c0_i32 = arith.constant 0 : i32
    %c0_i32_0 = arith.constant 0 : i32
    %c0_i32_1 = arith.constant 0 : i32
    return %c0_i32, %c0_i32_0 : i32, i32
  }
  func.func @transform_4(%arg0: i32) -> (i32, i32) {
    %c0_i32 = arith.constant 0 : i32
    %c0_i32_0 = arith.constant 0 : i32
    %c0_i32_1 = arith.constant 0 : i32
    return %c0_i32, %c0_i32_0 : i32, i32
  }
  func.func @transform_5(%arg0: i32) -> (i32, i32) {
    %c0_i32 = arith.constant 0 : i32
    %c0_i32_0 = arith.constant 0 : i32
    %c0_i32_1 = arith.constant 0 : i32
    return %c0_i32, %c0_i32_0 : i32, i32
  }
  func.func @transform_6(%arg0: i32) -> (i32, i32) {
    %c0_i32 = arith.constant 0 : i32
    %c0_i32_0 = arith.constant 0 : i32
    %c0_i32_1 = arith.constant 0 : i32
    return %c0_i32, %c0_i32_0 : i32, i32
  }
  func.func @transform_7(%arg0: i32) -> (i32, i32) {
    %c0_i32 = arith.constant 0 : i32
    %c0_i32_0 = arith.constant 0 : i32
    %c0_i32_1 = arith.constant 0 : i32
    return %c0_i32, %c0_i32_0 : i32, i32
  }
  func.func @transform_8(%arg0: i32) -> (i32, i32) {
    %c0_i32 = arith.constant 0 : i32
    %c0_i32_0 = arith.constant 0 : i32
    %c0_i32_1 = arith.constant 0 : i32
    return %c0_i32, %c0_i32_0 : i32, i32
  }
  func.func @transform_9(%arg0: i32) -> (i32, i32) {
    %c0_i32 = arith.constant 0 : i32
    %c0_i32_0 = arith.constant 0 : i32
    %c0_i32_1 = arith.constant 0 : i32
    return %c0_i32, %c0_i32_0 : i32, i32
  }
  func.func @transform_10(%arg0: i32) -> (i32, i32) {
    %c0_i32 = arith.constant 0 : i32
    %c0_i32_0 = arith.constant 0 : i32
    %c0_i32_1 = arith.constant 0 : i32
    return %c0_i32, %c0_i32_0 : i32, i32
  }
  func.func @transform_11(%arg0: i32) -> (i32, i32) {
    %c0_i32 = arith.constant 0 : i32
    %c0_i32_0 = arith.constant 0 : i32
    %c0_i32_1 = arith.constant 0 : i32
    return %c0_i32, %c0_i32_0 : i32, i32
  }
}

</mosaic_0001>

<bundles_post_ra>
// kernel: tpu_custom_call.1
= control target key start
LH: loop header
LB: loop body
LE: loop exit
PB: predicated region body
PF: predicated region fallthrough
CT: control target
= control target key end

     0   :  { %s4566_s0 = inlined_call_operand.vmem [shape: f32[16,8], index: 0, kind: input, shape index: {}]   ;;  %s4567_s1 = inlined_call_operand.vmem [shape: f32[8,64], index: 1, kind: input, shape index: {}]   ;;  %s4568_s2 = inlined_call_operand.vmem [shape: f32[1,32], index: 2, kind: input, shape index: {}]   ;;  %s4569_s3 = inlined_call_operand.vmem [shape: f32[1,32], index: 3, kind: input, shape index: {}]   ;;  %s4570_s4 = inlined_call_operand.vmem [shape: f32[1,32], index: 4, kind: input, shape index: {}]   ;;  %s4571_s5 = inlined_call_operand.vmem [shape: f32[32,32], index: 5, kind: input, shape index: {}]   ;;  %s4572_s6 = inlined_call_operand.vmem [shape: f32[1,32], index: 6, kind: input, shape index: {}]   ;;  %s4573_s7 = inlined_call_operand.vmem [shape: f32[1,32], index: 7, kind: input, shape index: {}]   ;;  %s4574_s8 = inlined_call_operand.vmem [shape: f32[1,32], index: 8, kind: input, shape index: {}]   ;;  %s4575_s9 = inlined_call_operand.vmem [shape: f32[1,32], index: 9, kind: input, shape index: {}]   ;;  %s4576_s10 = inlined_call_operand.<no memory space> [shape: f32[1,1], index: 10, kind: input, shape index: {}]   ;;  %s4577_s11 = inlined_call_operand.hbm [shape: f32[16,16], index: 11, kind: output, shape index: {}]  }
   0x1   :  { %v16_v0 = vstv %s4576_s10 }
   0x2   :  { %17 = vst [vmem:[#allocation2] sm:$0x1] %v16_v0 }
   0x3   :  { %v43_v1 = vld [vmem:[%s4567_s1] sm:$0xff]  ;;  %vm44_vm0 = vcmask 64512   ;;  %v42_v3 = vld [vmem:[%s4566_s0 + $0x8] sm:$0xff] }
   0x4   :  { %v41_v2 = vld [vmem:[%s4566_s0] sm:$0xff]  ;;  %2690 = vmatprep.subr.mxu0 %v43_v1 }
   0x5   :  { %2692 = vmatprep.mubr.msk.f32.mxu0 %vm44_vm0, %v41_v2 }
   0x6   :  { %18 = vsyncpa [#allocation4], 0  ;;  %2691 = vmatpush3.msra.mxu0 %v43_v1  ;;  %s2928_s10 = smov 96   ;;  %v705_v6 = vld [vmem:[%s4571_s5] sm:$0xff]  ;;  %v706_v7 = vld [vmem:[%s4571_s5 + $0x8] sm:$0xff]  ;;  %v141_v14 = vlaneseq  ;;  %vm357_vm1 = vcmask 261120  }
   0x7   :  { %2693 = vmatmul.mubr.msk.f32.vlgmr.msra.gmra.mrb[0].mxu0 %vm44_vm0, %v42_v3  ;;  %v707_v8 = vld [vmem:[%s4571_s5 + $0x10] sm:$0xff]  ;;  %v2751_v9 = vpack.c.bf16 %v706_v7, %v705_v6  ;;  %v708_v10 = vld [vmem:[%s4571_s5 + $0x18] sm:$0xff]  ;;  %v2929_v12 = vmov 1966171168   ;;  %v2579_v17 = vld [vmem:[%s4568_s2] ss:$0 sm:$0xff] }
   0x8   :  { %v2755_v11 = vpack.c.bf16 %v708_v10, %v707_v8  ;;  %v139_v13 = vunpack.c.l.s4 %v2929_v12  ;;  %v3022_v16 = vshrl.u32 %v141_v14, 7  ;;  %vm1605_vm2 = vcmask 130112  }
   0x9   :  { %2752 = vmatprep.subr.bf16.mxu0 %v2751_v9  ;;  %2759 = vmatprep.subr.bf16.mxu1 %v2751_v9  ;;  %vm1742_vm3 = vcmask 1041409   ;;  %vm1744_vm4 = vcmask 1042434   ;;  %vm1746_vm5 = vcmask 1043459   ;;  %vm1748_vm6 = vcmask 1044484  }
   0xa   :  { %2754 = vmatpush3.bf16.msra.mxu0 %v2751_v9  ;;  %2761 = vmatpush3.bf16.msra.mxu1 %v2751_v9  ;;  %v140_v15 = vunpack.c.0.s8 %v139_v13  ;;  %v3034_v23 = vsub.s32 0, %v3022_v16  ;;  %vm1750_vm7 = vcmask 1045509   ;;  %vm1752_vm8 = vcmask 1046534  }
   0xb   :  { %2756 = vmatprep.subr.bf16.mxu0 %v2755_v11  ;;  %2760 = vmatprep.subr.bf16.mxu1 %v2755_v11  ;;  %vm1754_vm9 = vcmask 1047559   ;;  %vm2558_vm11 = vcmask 130048  }
   0xc   :  { %v3028_v18 = vsub.s32 %v140_v15, %v3022_v16 }
   0xe   :  { %2758 = vmatpush3.bf16.msra.mxu0 %v2755_v11  ;;  %2762 = vmatpush3.bf16.msra.mxu1 %v2755_v11 }
  0xda   :  { %v3006_v4 = vpop.f32.mrb[0].mxu0 }
  0xdb   :  { %v117_v5 = vpop.f32.mrb[1].mxu0  ;;  %v134_v60 = vadd.f32 %v3006_v4, %v2579_v17 }
  0xdc   :  { %317 = vrot.lane.b32.xlu0 %v117_v5, %s2928_s10  ;;  %v133_v19 = vadd.f32 %v2579_v17, %v117_v5 }
  0xdd   :  { %v193_v6 = vrot.slane %v134_v60, %v3028_v18 }
  0xde   :  { %v144_v20 = vrot.slane %v133_v19, %v3028_v18  ;;  %v137_v28 = vcombine.high %v133_v19, %v133_v19 }
  0xdf   :  { %v201_v15 = vcombine.high %v193_v6, %v193_v6  ;;  %v209_v19 = vrot.slane %v193_v6, %v3028_v18 }
  0xe0   :  { %319 = vrot.lane.b32.xlu0 %v3006_v4, %s2928_s10  ;;  %v152_v21 = vcombine.high %v144_v20, %v144_v20  ;;  %v160_v24 = vrot.slane %v144_v20, %v3028_v18  ;;  %v151_v34 = vrot.slane %v137_v28, %v3028_v18 }
  0xe2   :  { %v174_v25 = vrot.slane %v152_v21, %v3028_v18  ;;  %v238_v27 = vrot.slane %v160_v24, %v3034_v23  ;;  %v182_v29 = vcombine.high %v160_v24, %v160_v24  ;;  %v153_v43 = vcombine.high %v151_v34, %v151_v34 }
  0xe3   :  { %v167_v45 = vrot.slane %v151_v34, %v3028_v18  ;;  %v270_v34 = vrot.slane %v209_v19, %v3034_v23 }
  0xe4   :  { %v242_v30 = vrot.slane %v174_v25, %v3034_v23  ;;  %v184_v35 = vcombine.high %v174_v25, %v174_v25  ;;  %v246_v36 = vrot.slane %v182_v29, %v3034_v23  ;;  %v181_v53 = vrot.slane %v153_v43, %v3028_v18 }
  0xe5   :  { %v254_v54 = vrot.slane %v167_v45, %v3034_v23  ;;  %v183_v62 = vcombine.high %v167_v45, %v167_v45 }
  0xe6   :  { %v250_v46 = vrot.slane %v184_v35, %v3034_v23  ;;  %v258_v63 = vrot.slane %v181_v53, %v3034_v23  ;;  %v185_v7 = vcombine.high %v181_v53, %v181_v53 }
  0xe7   :  { %v262_v8 = vrot.slane %v183_v62, %v3034_v23 }
  0xe8   :  { %v266_v20 = vrot.slane %v185_v7, %v3034_v23 }
 0x14e   :  { %v3031_v22 = vpop.permute.xlu0 %317 }
 0x14f   :  { %v3043_v31 = vadd.f32 %v3031_v22, %v238_v27  ;;  %v3049_v33 = vadd.f32 %v3031_v22, %v242_v30  ;;  %v3061_v41 = vadd.f32 %v3031_v22, %v246_v36  ;;  %v3073_v50 = vadd.f32 %v3031_v22, %v250_v46 }
 0x150   :  { %v3085_v58 = vadd.f32 %v3031_v22, %v254_v54  ;;  %v3097_v3 = vadd.f32 %v3031_v22, %v258_v63  ;;  %v3109_v12 = vadd.f32 %v3031_v22, %v262_v8 }
 0x151   :  { %v358_v38 = vsel %vm357_vm1, %v3043_v31, 0.0  ;;  %v361_v42 = vsel %vm357_vm1, %v3049_v33, 0.0  ;;  %v365_v51 = vsel %vm357_vm1, %v3061_v41, 0.0  ;;  %v369_v59 = vsel %vm357_vm1, %v3073_v50, 0.0 }
 0x152   :  { %v3038_v26 = vpop.permute.xlu0 %319  ;;  %v373_v5 = vsel %vm357_vm1, %v3085_v58, 0.0  ;;  %v377_v13 = vsel %vm357_vm1, %v3097_v3, 0.0  ;;  %v381_v28 = vsel %vm357_vm1, %v3109_v12, 0.0 }
 0x153   :  { %v3046_v32 = vadd.f32 %v3038_v26, %v238_v27  ;;  %v3054_v37 = vadd.f32 %v3038_v26, %v242_v30  ;;  %v3068_v47 = vadd.f32 %v3038_v26, %v246_v36  ;;  %v3080_v55 = vadd.f32 %v3038_v26, %v250_v46 }
 0x154   :  { %v3092_v0 = vadd.f32 %v3038_v26, %v254_v54  ;;  %v3104_v9 = vadd.f32 %v3038_v26, %v258_v63  ;;  %v3116_v21 = vadd.f32 %v3038_v26, %v262_v8  ;;  %v3121_v27 = vadd.f32 %v3031_v22, %v266_v20 }
 0x155   :  { %v359_v39 = vsel %vm357_vm1, %v3046_v32, 0.0  ;;  %v363_v48 = vsel %vm357_vm1, %v3054_v37, 0.0  ;;  %v367_v56 = vsel %vm357_vm1, %v3068_v47, 0.0  ;;  %v371_v1 = vsel %vm357_vm1, %v3080_v55, 0.0 }
 0x156   :  { %v360_v40 = vadd.f32 %v359_v39, %v358_v38  ;;  %v375_v10 = vsel %vm357_vm1, %v3092_v0, 0.0  ;;  %v379_v24 = vsel %vm357_vm1, %v3104_v9, 0.0  ;;  %v223_v30 = vrot.slane %v201_v15, %v3028_v18 }
 0x157   :  { %v3128_v35 = vadd.f32 %v3038_v26, %v266_v20  ;;  %v383_v36 = vsel %vm357_vm1, %v3116_v21, 0.0  ;;  %v3133_v39 = vadd.f32 %v3031_v22, %v270_v34  ;;  %v3139_v46 = vadd.f32 %v3038_v26, %v270_v34 }
 0x158   :  { %v362_v44 = vadd.f32 %v361_v42, %v360_v40  ;;  %v385_v40 = vsel %vm357_vm1, %v3121_v27, 0.0  ;;  %v186_v42 = vcombine.high %v134_v60, %v134_v60  ;;  %v274_v45 = vrot.slane %v223_v30, %v3034_v23 }
 0x159   :  { %v391_v60 = vsel %vm357_vm1, %v3139_v46, 0.0 }
 0x15a   :  { %v364_v49 = vadd.f32 %v363_v48, %v362_v44  ;;  %v231_v44 = vcombine.high %v209_v19, %v209_v19  ;;  %v387_v48 = vsel %vm357_vm1, %v3128_v35, 0.0  ;;  %v200_v53 = vrot.slane %v186_v42, %v3028_v18 }
 0x15c   :  { %v366_v52 = vadd.f32 %v365_v51, %v364_v49  ;;  %v3144_v51 = vadd.f32 %v3031_v22, %v274_v45 }
 0x15e   :  { %v368_v57 = vadd.f32 %v367_v56, %v366_v52  ;;  %v389_v52 = vsel %vm357_vm1, %v3133_v39, 0.0  ;;  %v233_v56 = vcombine.high %v223_v30, %v223_v30  ;;  %v393_v63 = vsel %vm357_vm1, %v3144_v51, 0.0 }
 0x160   :  { %v370_v61 = vadd.f32 %v369_v59, %v368_v57  ;;  %v278_v57 = vrot.slane %v231_v44, %v3034_v23  ;;  %v3151_v59 = vadd.f32 %v3038_v26, %v274_v45  ;;  %v282_v6 = vrot.slane %v233_v56, %v3034_v23 }
 0x162   :  { %v372_v2 = vadd.f32 %v371_v1, %v370_v61  ;;  %v3156_v62 = vadd.f32 %v3031_v22, %v278_v57  ;;  %v202_v1 = vcombine.high %v200_v53, %v200_v53  ;;  %v395_v7 = vsel %vm357_vm1, %v3151_v59, 0.0 }
 0x163   :  { %v3175_v19 = vadd.f32 %v3038_v26, %v282_v6 }
 0x164   :  { %v374_v4 = vadd.f32 %v373_v5, %v372_v2  ;;  %v216_v5 = vrot.slane %v200_v53, %v3028_v18  ;;  %v230_v15 = vrot.slane %v202_v1, %v3028_v18 }
 0x166   :  { %v376_v11 = vadd.f32 %v375_v10, %v374_v4  ;;  %v3163_v4 = vadd.f32 %v3038_v26, %v278_v57  ;;  %v3168_v10 = vadd.f32 %v3031_v22, %v282_v6  ;;  %v232_v30 = vcombine.high %v216_v5, %v216_v5 }
 0x167   :  { %v290_v34 = vrot.slane %v230_v15, %v3034_v23  ;;  %v234_v44 = vcombine.high %v230_v15, %v230_v15 }
 0x168   :  { %v378_v17 = vadd.f32 %v377_v13, %v376_v11  ;;  %v397_v11 = vsel %vm357_vm1, %v3156_v62, 0.0  ;;  %v399_v20 = vsel %vm357_vm1, %v3163_v4, 0.0  ;;  %v294_v45 = vrot.slane %v232_v30, %v3034_v23 }
 0x169   :  { %v298_v57 = vrot.slane %v234_v44, %v3034_v23 }
 0x16a   :  { %v380_v25 = vadd.f32 %v379_v24, %v378_v17  ;;  %v286_v17 = vrot.slane %v216_v5, %v3034_v23  ;;  %v3202_v53 = vadd.f32 %v3031_v22, %v294_v45 }
 0x16b   :  { %v3213_v1 = vadd.f32 %v3031_v22, %v298_v57  ;;  %v3218_v6 = vadd.f32 %v3038_v26, %v298_v57 }
 0x16c   :  { %v382_v29 = vadd.f32 %v381_v28, %v380_v25  ;;  %v3180_v25 = vadd.f32 %v3031_v22, %v286_v17  ;;  %v401_v28 = vsel %vm357_vm1, %v3168_v10, 0.0  ;;  %v3186_v18 = vadd.f32 %v3038_v26, %v286_v17 }
 0x16d   :  { %v419_v15 = vsel %vm357_vm1, %v3218_v6, 0.0 }
 0x16e   :  { %v384_v38 = vadd.f32 %v383_v36, %v382_v29  ;;  %v403_v36 = vsel %vm357_vm1, %v3175_v19, 0.0  ;;  %v405_v42 = vsel %vm357_vm1, %v3180_v25, 0.0 }
 0x170   :  { %v386_v43 = vadd.f32 %v385_v40, %v384_v38  ;;  %v3191_v40 = vadd.f32 %v3031_v22, %v290_v34 }
 0x172   :  { %v388_v49 = vadd.f32 %v387_v48, %v386_v43  ;;  %v3197_v48 = vadd.f32 %v3038_v26, %v290_v34 }
 0x174   :  { %v390_v54 = vadd.f32 %v389_v52, %v388_v49  ;;  %v407_v49 = vsel %vm357_vm1, %v3186_v18, 0.0 }
 0x176   :  { %v392_v61 = vadd.f32 %v391_v60, %v390_v54  ;;  %v409_v54 = vsel %vm357_vm1, %v3191_v40, 0.0  ;;  %v3208_v60 = vadd.f32 %v3038_v26, %v294_v45 }
 0x178   :  { %v394_v2 = vadd.f32 %v393_v63, %v392_v61  ;;  %v411_v61 = vsel %vm357_vm1, %v3197_v48, 0.0 }
 0x17a   :  { %v396_v8 = vadd.f32 %v395_v7, %v394_v2  ;;  %v413_v2 = vsel %vm357_vm1, %v3202_v53, 0.0  ;;  %v415_v7 = vsel %vm357_vm1, %v3208_v60, 0.0 }
 0x17c   :  { %v398_v13 = vadd.f32 %v397_v11, %v396_v8  ;;  %v417_v11 = vsel %vm357_vm1, %v3213_v1, 0.0 }
 0x17e   :  { %v400_v24 = vadd.f32 %v399_v20, %v398_v13 }
 0x180   :  { %v402_v29 = vadd.f32 %v401_v28, %v400_v24 }
 0x182   :  { %v404_v38 = vadd.f32 %v403_v36, %v402_v29 }
 0x184   :  { %v406_v43 = vadd.f32 %v405_v42, %v404_v38 }
 0x186   :  { %v408_v52 = vadd.f32 %v407_v49, %v406_v43 }
 0x188   :  { %v410_v56 = vadd.f32 %v409_v54, %v408_v52 }
 0x18a   :  { %v412_v63 = vadd.f32 %v411_v61, %v410_v56 }
 0x18c   :  { %v414_v5 = vadd.f32 %v413_v2, %v412_v63 }
 0x18e   :  { %v416_v8 = vadd.f32 %v415_v7, %v414_v5 }
 0x190   :  { %v418_v13 = vadd.f32 %v417_v11, %v416_v8 }
 0x192   :  { %v420_v22 = vadd.f32 %v419_v15, %v418_v13 }
 0x194   :  { %v421_v17 = vrot.slane %v420_v22, 4 }
 0x196   :  { %v422_v20 = vadd.f32 %v421_v17, %v420_v22 }
 0x198   :  { %v423_v24 = vrot.slane %v422_v20, 2 }
 0x19a   :  { %v424_v28 = vadd.f32 %v423_v24, %v422_v20 }
 0x19c   :  { %v425_v29 = vrot.slane %v424_v28, 1 }
 0x19e   :  { %v426_v30 = vadd.f32 %v425_v29, %v424_v28 }
 0x1a0   :  { %v3226_v26 = vmul.f32 0.00390625, %v426_v30 }
 0x1a2   :  { %v3230_v34 = vsub.f32 %v3043_v31, %v3226_v26  ;;  %v3234_v36 = vsub.f32 %v3046_v32, %v3226_v26  ;;  %v3238_v38 = vsub.f32 %v3049_v33, %v3226_v26  ;;  %v3242_v42 = vsub.f32 %v3054_v37, %v3226_v26 }
 0x1a3   :  { %v3250_v31 = vsub.f32 %v3061_v41, %v3226_v26  ;;  %v3256_v33 = vsub.f32 %v3068_v47, %v3226_v26  ;;  %v3264_v54 = vsub.f32 %v3073_v50, %v3226_v26  ;;  %v3271_v47 = vsub.f32 %v3080_v55, %v3226_v26 }
 0x1a4   :  { %v461_v43 = vmul.f32 %v3230_v34, %v3230_v34  ;;  %v462_v44 = vmul.f32 %v3234_v36, %v3234_v36  ;;  %v463_v32 = vmul.f32 %v3238_v38, %v3238_v38  ;;  %v464_v37 = vmul.f32 %v3242_v42, %v3242_v42 }
 0x1a5   :  { %v465_v41 = vmul.f32 %v3250_v31, %v3250_v31  ;;  %v466_v61 = vmul.f32 %v3256_v33, %v3256_v33  ;;  %v3278_v50 = vsub.f32 %v3085_v58, %v3226_v26  ;;  %v467_v5 = vmul.f32 %v3264_v54, %v3264_v54 }
 0x1a6   :  { %v493_v45 = vsel %vm357_vm1, %v461_v43, 0.0  ;;  %v494_v49 = vsel %vm357_vm1, %v462_v44, 0.0  ;;  %v496_v56 = vsel %vm357_vm1, %v463_v32, 0.0  ;;  %v498_v63 = vsel %vm357_vm1, %v464_v37, 0.0 }
 0x1a7   :  { %v495_v52 = vadd.f32 %v494_v49, %v493_v45  ;;  %v500_v7 = vsel %vm357_vm1, %v465_v41, 0.0  ;;  %v3285_v55 = vsub.f32 %v3092_v0, %v3226_v26  ;;  %v468_v11 = vmul.f32 %v3271_v47, %v3271_v47 }
 0x1a8   :  { %v502_v13 = vsel %vm357_vm1, %v466_v61, 0.0  ;;  %v3292_v58 = vsub.f32 %v3097_v3, %v3226_v26  ;;  %v469_v22 = vmul.f32 %v3278_v50, %v3278_v50  ;;  %v504_v17 = vsel %vm357_vm1, %v467_v5, 0.0 }
 0x1a9   :  { %v497_v57 = vadd.f32 %v496_v56, %v495_v52  ;;  %v3299_v0 = vsub.f32 %v3104_v9, %v3226_v26  ;;  %v470_v24 = vmul.f32 %v3285_v55, %v3285_v55  ;;  %v506_v28 = vsel %vm357_vm1, %v468_v11, 0.0 }
 0x1aa   :  { %v3306_v3 = vsub.f32 %v3109_v12, %v3226_v26  ;;  %v471_v30 = vmul.f32 %v3292_v58, %v3292_v58  ;;  %v508_v43 = vsel %vm357_vm1, %v469_v22, 0.0  ;;  %v3313_v9 = vsub.f32 %v3116_v21, %v3226_v26 }
 0x1ab   :  { %v499_v2 = vadd.f32 %v498_v63, %v497_v57  ;;  %v472_v32 = vmul.f32 %v3299_v0, %v3299_v0  ;;  %v510_v37 = vsel %vm357_vm1, %v470_v24, 0.0  ;;  %v3320_v12 = vsub.f32 %v3121_v27, %v3226_v26 }
 0x1ac   :  { %v473_v49 = vmul.f32 %v3306_v3, %v3306_v3  ;;  %v512_v52 = vsel %vm357_vm1, %v471_v30, 0.0  ;;  %v3327_v21 = vsub.f32 %v3128_v35, %v3226_v26  ;;  %v474_v56 = vmul.f32 %v3313_v9, %v3313_v9 }
 0x1ad   :  { %v501_v8 = vadd.f32 %v500_v7, %v499_v2  ;;  %v514_v57 = vsel %vm357_vm1, %v472_v32, 0.0  ;;  %v3334_v27 = vsub.f32 %v3133_v39, %v3226_v26  ;;  %v475_v63 = vmul.f32 %v3320_v12, %v3320_v12 }
 0x1ae   :  { %v516_v2 = vsel %vm357_vm1, %v473_v49, 0.0  ;;  %v3341_v35 = vsub.f32 %v3139_v46, %v3226_v26  ;;  %v476_v7 = vmul.f32 %v3327_v21, %v3327_v21  ;;  %v3348_v39 = vsub.f32 %v3144_v51, %v3226_v26 }
 0x1af   :  { %v503_v15 = vadd.f32 %v502_v13, %v501_v8  ;;  %v518_v8 = vsel %vm357_vm1, %v474_v56, 0.0  ;;  %v477_v13 = vmul.f32 %v3334_v27, %v3334_v27  ;;  %v3355_v46 = vsub.f32 %v3151_v59, %v3226_v26 }
 0x1b0   :  { %v3362_v51 = vsub.f32 %v3156_v62, %v3226_v26  ;;  %v3369_v59 = vsub.f32 %v3163_v4, %v3226_v26  ;;  %v3376_v62 = vsub.f32 %v3168_v10, %v3226_v26  ;;  %v3383_v4 = vsub.f32 %v3175_v19, %v3226_v26 }
 0x1b1   :  { %v505_v20 = vadd.f32 %v504_v17, %v503_v15  ;;  %v520_v15 = vsel %vm357_vm1, %v475_v63, 0.0  ;;  %v478_v17 = vmul.f32 %v3341_v35, %v3341_v35  ;;  %v3390_v10 = vsub.f32 %v3180_v25, %v3226_v26 }
 0x1b2   :  { %v3397_v19 = vsub.f32 %v3186_v18, %v3226_v26  ;;  %v3404_v25 = vsub.f32 %v3191_v40, %v3226_v26  ;;  %v3411_v18 = vsub.f32 %v3197_v48, %v3226_v26  ;;  %v3418_v40 = vsub.f32 %v3202_v53, %v3226_v26 }
 0x1b3   :  { %v507_v29 = vadd.f32 %v506_v28, %v505_v20  ;;  %v522_v20 = vsel %vm357_vm1, %v476_v7, 0.0  ;;  %v479_v28 = vmul.f32 %v3348_v39, %v3348_v39  ;;  %v3425_v48 = vsub.f32 %v3208_v60, %v3226_v26 }
 0x1b4   :  { %v3432_v53 = vsub.f32 %v3213_v1, %v3226_v26  ;;  %v3439_v60 = vsub.f32 %v3218_v6, %v3226_v26 }
 0x1b5   :  { %v509_v44 = vadd.f32 %v508_v43, %v507_v29  ;;  %v524_v29 = vsel %vm357_vm1, %v477_v13, 0.0  ;;  %v480_v43 = vmul.f32 %v3355_v46, %v3355_v46 }
 0x1b6   :  { %v491_v1 = vmul.f32 %v3432_v53, %v3432_v53 }
 0x1b7   :  { %v511_v45 = vadd.f32 %v510_v37, %v509_v44  ;;  %v526_v44 = vsel %vm357_vm1, %v478_v17, 0.0  ;;  %v481_v37 = vmul.f32 %v3362_v51, %v3362_v51 }
 0x1b8   :  { %v552_v6 = vsel %vm357_vm1, %v491_v1, 0.0 }
 0x1b9   :  { %v513_v41 = vadd.f32 %v512_v52, %v511_v45  ;;  %v528_v45 = vsel %vm357_vm1, %v479_v28, 0.0  ;;  %v482_v52 = vmul.f32 %v3369_v59, %v3369_v59 }
 0x1bb   :  { %v515_v61 = vadd.f32 %v514_v57, %v513_v41  ;;  %v530_v41 = vsel %vm357_vm1, %v480_v43, 0.0  ;;  %v483_v57 = vmul.f32 %v3376_v62, %v3376_v62 }
 0x1bd   :  { %v517_v5 = vadd.f32 %v516_v2, %v515_v61  ;;  %v532_v61 = vsel %vm357_vm1, %v481_v37, 0.0  ;;  %v484_v2 = vmul.f32 %v3383_v4, %v3383_v4 }
 0x1bf   :  { %v519_v11 = vadd.f32 %v518_v8, %v517_v5  ;;  %v534_v5 = vsel %vm357_vm1, %v482_v52, 0.0  ;;  %v485_v8 = vmul.f32 %v3390_v10, %v3390_v10 }
 0x1c1   :  { %v521_v22 = vadd.f32 %v520_v15, %v519_v11  ;;  %v536_v11 = vsel %vm357_vm1, %v483_v57, 0.0  ;;  %v486_v15 = vmul.f32 %v3397_v19, %v3397_v19  ;;  %v492_v57 = vmul.f32 %v3439_v60, %v3439_v60 }
 0x1c3   :  { %v523_v24 = vadd.f32 %v522_v20, %v521_v22  ;;  %v538_v22 = vsel %vm357_vm1, %v484_v2, 0.0  ;;  %v487_v20 = vmul.f32 %v3404_v25, %v3404_v25  ;;  %v554_v2 = vsel %vm357_vm1, %v492_v57, 0.0 }
 0x1c5   :  { %v525_v30 = vadd.f32 %v524_v29, %v523_v24  ;;  %v540_v24 = vsel %vm357_vm1, %v485_v8, 0.0  ;;  %v488_v29 = vmul.f32 %v3411_v18, %v3411_v18 }
 0x1c7   :  { %v527_v32 = vadd.f32 %v526_v44, %v525_v30  ;;  %v542_v30 = vsel %vm357_vm1, %v486_v15, 0.0  ;;  %v489_v44 = vmul.f32 %v3418_v40, %v3418_v40 }
 0x1c9   :  { %v529_v49 = vadd.f32 %v528_v45, %v527_v32  ;;  %v544_v32 = vsel %vm357_vm1, %v487_v20, 0.0  ;;  %v490_v45 = vmul.f32 %v3425_v48, %v3425_v48 }
 0x1cb   :  { %v531_v56 = vadd.f32 %v530_v41, %v529_v49  ;;  %v546_v49 = vsel %vm357_vm1, %v488_v29, 0.0  ;;  %v548_v41 = vsel %vm357_vm1, %v489_v44, 0.0 }
 0x1cd   :  { %v533_v63 = vadd.f32 %v532_v61, %v531_v56  ;;  %v550_v61 = vsel %vm357_vm1, %v490_v45, 0.0 }
 0x1cf   :  { %v535_v7 = vadd.f32 %v534_v5, %v533_v63 }
 0x1d1   :  { %v537_v13 = vadd.f32 %v536_v11, %v535_v7 }
 0x1d3   :  { %v539_v17 = vadd.f32 %v538_v22, %v537_v13 }
 0x1d5   :  { %v541_v28 = vadd.f32 %v540_v24, %v539_v17 }
 0x1d7   :  { %v543_v43 = vadd.f32 %v542_v30, %v541_v28  ;;  %v3457_v28 = vld [vmem:[%s4569_s3] ss:$0 sm:$0xff] }
 0x1d9   :  { %v545_v37 = vadd.f32 %v544_v32, %v543_v43  ;;  %v3470_v32 = vld [vmem:[%s4570_s4] ss:$0 sm:$0xff] }
 0x1db   :  { %v547_v52 = vadd.f32 %v546_v49, %v545_v37 }
 0x1dd   :  { %v549_v56 = vadd.f32 %v548_v41, %v547_v52 }
 0x1df   :  { %v551_v63 = vadd.f32 %v550_v61, %v549_v56 }
 0x1e1   :  { %v553_v26 = vadd.f32 %v552_v6, %v551_v63 }
 0x1e3   :  { %v555_v5 = vadd.f32 %v554_v2, %v553_v26 }
 0x1e5   :  { %v556_v7 = vrot.slane %v555_v5, 4 }
 0x1e7   :  { %v557_v8 = vadd.f32 %v556_v7, %v555_v5 }
 0x1e9   :  { %v558_v11 = vrot.slane %v557_v8, 2 }
 0x1eb   :  { %v559_v13 = vadd.f32 %v558_v11, %v557_v8 }
 0x1ed   :  { %v560_v15 = vrot.slane %v559_v13, 1 }
 0x1ef   :  { %v561_v22 = vadd.f32 %v560_v15, %v559_v13 }
 0x1f1   :  { %v562_v17 = vmul.f32 0.00390625, %v561_v22 }
 0x1f3   :  { %v563_v20 = vadd.f32 1e-05, %v562_v17 }
 0x1f5   :  { %2772 = vrsqrt.f32 %v563_v20 }
 0x1ff   :  { %v3452_v24 = vpop.eup %2772 }
 0x200   :  { %v565_v29 = vmul.f32 %v3452_v24, %v3230_v34  ;;  %v579_v30 = vmul.f32 %v3452_v24, %v3320_v12  ;;  %v566_v43 = vmul.f32 %v3452_v24, %v3234_v36  ;;  %v580_v44 = vmul.f32 %v3452_v24, %v3327_v21 }
 0x201   :  { %v567_v37 = vmul.f32 %v3452_v24, %v3238_v38  ;;  %v581_v34 = vmul.f32 %v3452_v24, %v3334_v27  ;;  %v568_v12 = vmul.f32 %v3452_v24, %v3242_v42  ;;  %v582_v36 = vmul.f32 %v3452_v24, %v3341_v35 }
 0x202   :  { %v603_v45 = vmul.f32 %v3457_v28, %v565_v29  ;;  %v617_v21 = vmul.f32 %v3457_v28, %v579_v30  ;;  %v604_v49 = vmul.f32 %v3457_v28, %v566_v43  ;;  %v618_v52 = vmul.f32 %v3457_v28, %v580_v44 }
 0x203   :  { %v605_v1 = vmul.f32 %v3457_v28, %v567_v37  ;;  %v619_v38 = vmul.f32 %v3457_v28, %v581_v34  ;;  %v606_v27 = vmul.f32 %v3457_v28, %v568_v12  ;;  %v620_v41 = vmul.f32 %v3457_v28, %v582_v36 }
 0x204   :  { %v641_v42 = vadd.f32 %v3470_v32, %v603_v45  ;;  %v655_v35 = vadd.f32 %v3470_v32, %v617_v21  ;;  %v642_v56 = vadd.f32 %v3470_v32, %v604_v49  ;;  %v656_v57 = vadd.f32 %v3470_v32, %v618_v52 }
 0x205   :  { %v643_v61 = vadd.f32 %v3470_v32, %v605_v1  ;;  %v657_v63 = vadd.f32 %v3470_v32, %v619_v38  ;;  %v644_v6 = vadd.f32 %v3470_v32, %v606_v27  ;;  %v658_v26 = vadd.f32 %v3470_v32, %v620_v41 }
 0x206   :  { %v673_v2 = vmax.f32 %v641_v42, 0.0  ;;  %v687_v5 = vmax.f32 %v655_v35, 0.0  ;;  %v674_v7 = vmax.f32 %v642_v56, 0.0  ;;  %v688_v8 = vmax.f32 %v656_v57, 0.0 }
 0x207   :  { %v675_v11 = vmax.f32 %v643_v61, 0.0  ;;  %v689_v13 = vmax.f32 %v657_v63, 0.0  ;;  %v569_v15 = vmul.f32 %v3452_v24, %v3250_v31  ;;  %v583_v22 = vmul.f32 %v3452_v24, %v3348_v39 }
 0x208   :  { %2703 = vmatprep.mubr.msk.f32.mxu0 %vm357_vm1, %v673_v2  ;;  %2724 = vmatprep.mubr.msk.f32.mxu1 %vm357_vm1, %v687_v5  ;;  %v570_v17 = vmul.f32 %v3452_v24, %v3256_v33  ;;  %v676_v20 = vmax.f32 %v644_v6, 0.0  ;;  %v584_v29 = vmul.f32 %v3452_v24, %v3355_v46  ;;  %v571_v30 = vmul.f32 %v3452_v24, %v3264_v54 }
 0x209   :  { %2704 = vmatmul.mubr.msk.f32.vlgmr.msra.gmra.mrb[2].mxu0 %vm357_vm1, %v674_v7  ;;  %2725 = vmatmul.mubr.msk.f32.vlgmr.msra.gmra.mrb[0].mxu1 %vm357_vm1, %v688_v8  ;;  %v585_v31 = vmul.f32 %v3452_v24, %v3362_v51  ;;  %v690_v39 = vmax.f32 %v658_v26, 0.0  ;;  %v607_v33 = vmul.f32 %v3457_v28, %v569_v15  ;;  %v621_v43 = vmul.f32 %v3457_v28, %v583_v22 }
 0x20a   :  { %2706 = vmatprep.mubr.msk.f32.mxu0 %vm357_vm1, %v675_v11  ;;  %2727 = vmatprep.mubr.msk.f32.mxu1 %vm357_vm1, %v689_v13  ;;  %v608_v44 = vmul.f32 %v3457_v28, %v570_v17  ;;  %v622_v37 = vmul.f32 %v3457_v28, %v584_v29  ;;  %v609_v46 = vmul.f32 %v3457_v28, %v571_v30 }
 0x20b   :  { %v623_v54 = vmul.f32 %v3457_v28, %v585_v31  ;;  %v572_v51 = vmul.f32 %v3452_v24, %v3271_v47  ;;  %v645_v34 = vadd.f32 %v3470_v32, %v607_v33  ;;  %v659_v12 = vadd.f32 %v3470_v32, %v621_v43 }
 0x20c   :  { %v646_v36 = vadd.f32 %v3470_v32, %v608_v44  ;;  %v586_v45 = vmul.f32 %v3452_v24, %v3369_v59  ;;  %v660_v21 = vadd.f32 %v3470_v32, %v622_v37  ;;  %v647_v49 = vadd.f32 %v3470_v32, %v609_v46 }
 0x20d   :  { %2707 = vmatmul.mubr.msk.f32.gmra.mrb[4].mxu0 %vm357_vm1, %v676_v20  ;;  %2728 = vmatmul.mubr.msk.f32.gmra.mrb[2].mxu1 %vm357_vm1, %v690_v39  ;;  %v661_v52 = vadd.f32 %v3470_v32, %v623_v54  ;;  %v677_v47 = vmax.f32 %v645_v34, 0.0  ;;  %v691_v1 = vmax.f32 %v659_v12, 0.0  ;;  %v610_v38 = vmul.f32 %v3457_v28, %v572_v51 }
 0x20e   :  { %v678_v27 = vmax.f32 %v646_v36, 0.0  ;;  %v692_v41 = vmax.f32 %v660_v21, 0.0  ;;  %v679_v42 = vmax.f32 %v647_v49, 0.0  ;;  %v624_v35 = vmul.f32 %v3457_v28, %v586_v45 }
 0x20f   :  { %2709 = vmatprep.mubr.msk.f32.mxu0 %vm357_vm1, %v677_v47  ;;  %2730 = vmatprep.mubr.msk.f32.mxu1 %vm357_vm1, %v691_v1  ;;  %v693_v59 = vmax.f32 %v661_v52, 0.0  ;;  %v648_v56 = vadd.f32 %v3470_v32, %v610_v38  ;;  %v573_v57 = vmul.f32 %v3452_v24, %v3278_v50  ;;  %v587_v61 = vmul.f32 %v3452_v24, %v3376_v62 }
 0x210   :  { %v662_v63 = vadd.f32 %v3470_v32, %v624_v35  ;;  %v574_v6 = vmul.f32 %v3452_v24, %v3285_v55  ;;  %v588_v26 = vmul.f32 %v3452_v24, %v3383_v4  ;;  %v575_v5 = vmul.f32 %v3452_v24, %v3292_v58 }
 0x211   :  { %2710 = vmatmul.mubr.msk.f32.gmra.mrb[6].mxu0 %vm357_vm1, %v678_v27  ;;  %2731 = vmatmul.mubr.msk.f32.gmra.mrb[4].mxu1 %vm357_vm1, %v692_v41  ;;  %v680_v50 = vmax.f32 %v648_v56, 0.0  ;;  %v611_v2 = vmul.f32 %v3457_v28, %v573_v57  ;;  %v625_v62 = vmul.f32 %v3457_v28, %v587_v61  ;;  %v589_v4 = vmul.f32 %v3452_v24, %v3390_v10 }
 0x212   :  { %2712 = vmatprep.mubr.msk.f32.mxu0 %vm357_vm1, %v679_v42  ;;  %2733 = vmatprep.mubr.msk.f32.mxu1 %vm357_vm1, %v693_v59  ;;  %v694_v7 = vmax.f32 %v662_v63, 0.0  ;;  %v612_v8 = vmul.f32 %v3457_v28, %v574_v6  ;;  %v626_v55 = vmul.f32 %v3457_v28, %v588_v26  ;;  %v613_v15 = vmul.f32 %v3457_v28, %v575_v5 }
 0x213   :  { %v649_v11 = vadd.f32 %v3470_v32, %v611_v2  ;;  %v663_v13 = vadd.f32 %v3470_v32, %v625_v62  ;;  %v576_v22 = vmul.f32 %v3452_v24, %v3299_v0  ;;  %v627_v20 = vmul.f32 %v3457_v28, %v589_v4 }
 0x214   :  { %v650_v58 = vadd.f32 %v3470_v32, %v612_v8  ;;  %v664_v17 = vadd.f32 %v3470_v32, %v626_v55  ;;  %v651_v30 = vadd.f32 %v3470_v32, %v613_v15  ;;  %v590_v43 = vmul.f32 %v3452_v24, %v3397_v19 }
 0x215   :  { %2713 = vmatmul.mubr.msk.f32.gmra.mrb[8].mxu0 %vm357_vm1, %v680_v50  ;;  %2734 = vmatmul.mubr.msk.f32.gmra.mrb[6].mxu1 %vm357_vm1, %v694_v7  ;;  %v681_v10 = vmax.f32 %v649_v11, 0.0  ;;  %v695_v29 = vmax.f32 %v663_v13, 0.0  ;;  %v614_v31 = vmul.f32 %v3457_v28, %v576_v22  ;;  %v665_v0 = vadd.f32 %v3470_v32, %v627_v20 }
 0x216   :  { %v682_v39 = vmax.f32 %v650_v58, 0.0  ;;  %v696_v33 = vmax.f32 %v664_v17, 0.0  ;;  %v683_v44 = vmax.f32 %v651_v30, 0.0  ;;  %v577_v46 = vmul.f32 %v3452_v24, %v3306_v3 }
 0x217   :  { %2715 = vmatprep.mubr.msk.f32.mxu0 %vm357_vm1, %v681_v10  ;;  %2736 = vmatprep.mubr.msk.f32.mxu1 %vm357_vm1, %v695_v29  ;;  %v652_v37 = vadd.f32 %v3470_v32, %v614_v31  ;;  %v591_v54 = vmul.f32 %v3452_v24, %v3404_v25  ;;  %v697_v51 = vmax.f32 %v665_v0, 0.0  ;;  %v628_v19 = vmul.f32 %v3457_v28, %v590_v43 }
 0x218   :  { %v578_v34 = vmul.f32 %v3452_v24, %v3313_v9  ;;  %v592_v12 = vmul.f32 %v3452_v24, %v3411_v18  ;;  %v615_v3 = vmul.f32 %v3457_v28, %v577_v46  ;;  %v593_v45 = vmul.f32 %v3452_v24, %v3418_v40 }
 0x219   :  { %2716 = vmatmul.mubr.msk.f32.gmra.mrb[10].mxu0 %vm357_vm1, %v682_v39  ;;  %2737 = vmatmul.mubr.msk.f32.gmra.mrb[8].mxu1 %vm357_vm1, %v696_v33  ;;  %v684_v36 = vmax.f32 %v652_v37, 0.0  ;;  %v629_v25 = vmul.f32 %v3457_v28, %v591_v54  ;;  %v666_v21 = vadd.f32 %v3470_v32, %v628_v19  ;;  %v594_v18 = vmul.f32 %v3452_v24, %v3425_v48 }
 0x21a   :  { %2718 = vmatprep.mubr.msk.f32.mxu0 %vm357_vm1, %v683_v44  ;;  %2739 = vmatprep.mubr.msk.f32.mxu1 %vm357_vm1, %v697_v51  ;;  %v616_v49 = vmul.f32 %v3457_v28, %v578_v34  ;;  %v630_v9 = vmul.f32 %v3457_v28, %v592_v12  ;;  %v653_v52 = vadd.f32 %v3470_v32, %v615_v3 }
 0x21b   :  { %v667_v47 = vadd.f32 %v3470_v32, %v629_v25  ;;  %v631_v1 = vmul.f32 %v3457_v28, %v593_v45  ;;  %v595_v40 = vmul.f32 %v3452_v24, %v3432_v53  ;;  %v698_v38 = vmax.f32 %v666_v21, 0.0 }
 0x21c   :  { %v654_v27 = vadd.f32 %v3470_v32, %v616_v49  ;;  %v668_v41 = vadd.f32 %v3470_v32, %v630_v9  ;;  %v632_v42 = vmul.f32 %v3457_v28, %v594_v18  ;;  %v685_v35 = vmax.f32 %v653_v52, 0.0 }
 0x21d   :  { %2719 = vmatmul.mubr.msk.f32.gmra.mrb[12].mxu0 %vm357_vm1, %v684_v36  ;;  %v699_v48 = vmax.f32 %v667_v47, 0.0  ;;  %v669_v59 = vadd.f32 %v3470_v32, %v631_v1  ;;  %v633_v56 = vmul.f32 %v3457_v28, %v595_v40  ;;  %2740 = vmatmul.mubr.msk.f32.gmra.mrb[10].mxu1 %vm357_vm1, %v698_v38  ;;  %v596_v53 = vmul.f32 %v3452_v24, %v3439_v60 }
 0x21e   :  { %v686_v57 = vmax.f32 %v654_v27, 0.0  ;;  %2721 = vmatprep.mubr.msk.f32.mxu0 %vm357_vm1, %v685_v35  ;;  %v700_v61 = vmax.f32 %v668_v41, 0.0  ;;  %v670_v63 = vadd.f32 %v3470_v32, %v632_v42 }
 0x21f   :  { %2742 = vmatprep.mubr.msk.f32.mxu1 %vm357_vm1, %v699_v48  ;;  %v634_v6 = vmul.f32 %v3457_v28, %v596_v53  ;;  %v701_v26 = vmax.f32 %v669_v59, 0.0  ;;  %v671_v50 = vadd.f32 %v3470_v32, %v633_v56  ;;  %v3627_v28 = vld [vmem:[%s4572_s6] ss:$0 sm:$0xff] }
 0x220   :  { %v702_v2 = vmax.f32 %v670_v63, 0.0 }
 0x221   :  { %2722 = vmatmul.mubr.msk.f32.gmra.mrb[14].mxu0 %vm357_vm1, %v686_v57  ;;  %2743 = vmatmul.mubr.msk.f32.gmra.mrb[12].mxu1 %vm357_vm1, %v700_v61  ;;  %v672_v60 = vadd.f32 %v3470_v32, %v634_v6  ;;  %v703_v24 = vmax.f32 %v671_v50, 0.0 }
 0x222   :  { %2745 = vmatprep.mubr.msk.f32.mxu1 %vm357_vm1, %v701_v26 }
 0x223   :  { %v704_v62 = vmax.f32 %v672_v60, 0.0 }
 0x225   :  { %2746 = vmatmul.mubr.msk.f32.gmra.mrb[14].mxu1 %vm357_vm1, %v702_v2 }
 0x226   :  { %2748 = vmatprep.mubr.msk.f32.mxu1 %vm357_vm1, %v703_v24 }
 0x229   :  { %2749 = vmatmul.mubr.msk.f32.gmra.mrb[16].mxu1 %vm357_vm1, %v704_v62 }
 0x2dc   :  { %v2705_v5 = vpop.f32.mrb[2].mxu0  ;;  %v3629_v7 = vpop.f32.mrb[0].mxu1 }
 0x2dd   :  { %v3632_v8 = vadd.f32 %v2705_v5, %v3627_v28  ;;  %v878_v32 = vpop.f32.mrb[3].mxu0  ;;  %v948_v55 = vpop.f32.mrb[1].mxu1 }
 0x2de   :  { %v3635_v4 = vadd.f32 %v3627_v28, %v878_v32 }
 0x2df   :  { %v1040_v11 = vsel %vm357_vm1, %v3632_v8, 0.0 }
 0x2e0   :  { %v1039_v13 = vsel %vm357_vm1, %v3635_v4, 0.0  ;;  %v2708_v15 = vpop.f32.mrb[4].mxu0  ;;  %v3641_v22 = vpop.f32.mrb[2].mxu1 }
 0x2e1   :  { %v888_v58 = vpop.f32.mrb[5].mxu0  ;;  %v3643_v17 = vpop.f32.mrb[3].mxu1  ;;  %v3646_v20 = vadd.f32 %v2708_v15, %v3627_v28  ;;  %v1041_v29 = vadd.f32 %v1040_v11, %v1039_v13 }
 0x2e2   :  { %v3649_v10 = vadd.f32 %v3627_v28, %v888_v58  ;;  %v3706_v58 = vadd.f32 %v3627_v28, %v948_v55  ;;  %v3720_v55 = vadd.f32 %v3627_v28, %v3643_v17 }
 0x2e3   :  { %v1044_v44 = vsel %vm357_vm1, %v3646_v20, 0.0 }
 0x2e4   :  { %v1042_v30 = vsel %vm357_vm1, %v3649_v10, 0.0  ;;  %v2711_v31 = vpop.f32.mrb[6].mxu0  ;;  %v3653_v39 = vpop.f32.mrb[4].mxu1 }
 0x2e5   :  { %v1043_v33 = vadd.f32 %v1042_v30, %v1041_v29  ;;  %v898_v0 = vpop.f32.mrb[7].mxu0  ;;  %v968_v43 = vpop.f32.mrb[5].mxu1  ;;  %v3658_v37 = vadd.f32 %v2711_v31, %v3627_v28  ;;  %v3712_v31 = vadd.f32 %v3629_v7, %v3627_v28  ;;  %v3726_v7 = vadd.f32 %v3641_v22, %v3627_v28 }
 0x2e6   :  { %v3661_v46 = vadd.f32 %v3627_v28, %v898_v0 }
 0x2e7   :  { %v1045_v54 = vadd.f32 %v1044_v44, %v1043_v33  ;;  %v1048_v25 = vsel %vm357_vm1, %v3658_v37, 0.0  ;;  %v1072_v17 = vsel %vm357_vm1, %v3726_v7, 0.0 }
 0x2e8   :  { %v1046_v51 = vsel %vm357_vm1, %v3661_v46, 0.0  ;;  %v2714_v19 = vpop.f32.mrb[8].mxu0  ;;  %v3665_v34 = vpop.f32.mrb[6].mxu1 }
 0x2e9   :  { %v1047_v12 = vadd.f32 %v1046_v51, %v1045_v54  ;;  %v908_v36 = vpop.f32.mrb[9].mxu0  ;;  %v978_v3 = vpop.f32.mrb[7].mxu1  ;;  %v3670_v45 = vadd.f32 %v2714_v19, %v3627_v28  ;;  %v1066_v51 = vsel %vm357_vm1, %v3706_v58, 0.0 }
 0x2ea   :  { %v3673_v21 = vadd.f32 %v3627_v28, %v908_v36 }
 0x2eb   :  { %v1049_v49 = vadd.f32 %v1048_v25, %v1047_v12  ;;  %v1052_v38 = vsel %vm357_vm1, %v3670_v45, 0.0  ;;  %v1068_v12 = vsel %vm357_vm1, %v3712_v31, 0.0 }
 0x2ec   :  { %v1050_v9 = vsel %vm357_vm1, %v3673_v21, 0.0  ;;  %v2717_v18 = vpop.f32.mrb[10].mxu0  ;;  %v2738_v52 = vpop.f32.mrb[8].mxu1 }
 0x2ed   :  { %v1051_v47 = vadd.f32 %v1050_v9, %v1049_v49  ;;  %v918_v1 = vpop.f32.mrb[11].mxu0  ;;  %v988_v40 = vpop.f32.mrb[9].mxu1  ;;  %v3680_v27 = vadd.f32 %v2717_v18, %v3627_v28  ;;  %v1070_v9 = vsel %vm357_vm1, %v3720_v55, 0.0  ;;  %v3731_v18 = vadd.f32 %v3627_v28, %v968_v43 }
 0x2ee   :  { %v3683_v41 = vadd.f32 %v3627_v28, %v918_v1  ;;  %v3737_v1 = vadd.f32 %v3653_v39, %v3627_v28 }
 0x2ef   :  { %v1053_v42 = vadd.f32 %v1052_v38, %v1051_v47  ;;  %v1056_v57 = vsel %vm357_vm1, %v3680_v27, 0.0  ;;  %v1074_v22 = vsel %vm357_vm1, %v3731_v18, 0.0 }
 0x2f0   :  { %v1054_v35 = vsel %vm357_vm1, %v3683_v41, 0.0  ;;  %v2720_v48 = vpop.f32.mrb[12].mxu0  ;;  %v2741_v61 = vpop.f32.mrb[10].mxu1  ;;  %v1076_v43 = vsel %vm357_vm1, %v3737_v1, 0.0 }
 0x2f1   :  { %v1055_v59 = vadd.f32 %v1054_v35, %v1053_v42  ;;  %v928_v56 = vpop.f32.mrb[13].mxu0  ;;  %v3690_v53 = vadd.f32 %v2720_v48, %v3627_v28  ;;  %v998_v26 = vpop.f32.mrb[11].mxu1  ;;  %v3742_v42 = vadd.f32 %v3627_v28, %v978_v3  ;;  %v3748_v48 = vadd.f32 %v3665_v34, %v3627_v28 }
 0x2f2   :  { %v3693_v63 = vadd.f32 %v3627_v28, %v928_v56  ;;  %v3753_v56 = vadd.f32 %v3627_v28, %v988_v40  ;;  %v999_v34 = vadd.f32 %v3627_v28, %v998_v26  ;;  %v1004_v40 = vadd.f32 %v2741_v61, %v3627_v28  ;;  %v2618_v26 = vld [vmem:[#allocation2] ss:$0 sm:$0xff] }
 0x2f3   :  { %v1057_v6 = vadd.f32 %v1056_v57, %v1055_v59  ;;  %v1060_v62 = vsel %vm357_vm1, %v3690_v53, 0.0  ;;  %v1078_v39 = vsel %vm357_vm1, %v3742_v42, 0.0  ;;  %v1080_v3 = vsel %vm357_vm1, %v3748_v48, 0.0 }
 0x2f4   :  { %v1058_v50 = vsel %vm357_vm1, %v3693_v63, 0.0  ;;  %v2723_v2 = vpop.f32.mrb[14].mxu0  ;;  %v2744_v32 = vpop.f32.mrb[12].mxu1 }
 0x2f5   :  { %v1059_v60 = vadd.f32 %v1058_v50, %v1057_v6  ;;  %v938_v24 = vpop.f32.mrb[15].mxu0  ;;  %v3700_v5 = vadd.f32 %v2723_v2, %v3627_v28  ;;  %v1008_v15 = vpop.f32.mrb[13].mxu1  ;;  %v3758_v6 = vadd.f32 %v2738_v52, %v3627_v28  ;;  %v1082_v2 = vsel %vm357_vm1, %v3753_v56, 0.0 }
 0x2f6   :  { %v3703_v11 = vadd.f32 %v3627_v28, %v938_v24  ;;  %v1088_v52 = vsel %vm357_vm1, %v1004_v40, 0.0 }
 0x2f7   :  { %v1061_v13 = vadd.f32 %v1060_v62, %v1059_v60  ;;  %v1064_v33 = vsel %vm357_vm1, %v3700_v5, 0.0  ;;  %v1084_v24 = vsel %vm357_vm1, %v3758_v6, 0.0 }
 0x2f8   :  { %v1062_v29 = vsel %vm357_vm1, %v3703_v11, 0.0  ;;  %v2747_v0 = vpop.f32.mrb[14].mxu1 }
 0x2f9   :  { %v1063_v30 = vadd.f32 %v1062_v29, %v1061_v13  ;;  %v1018_v54 = vpop.f32.mrb[15].mxu1  ;;  %v1086_v13 = vsel %vm357_vm1, %v999_v34, 0.0  ;;  %v1009_v29 = vadd.f32 %v3627_v28, %v1008_v15  ;;  %v1024_v15 = vadd.f32 %v2747_v0, %v3627_v28 }
 0x2fa   :  { %v1019_v61 = vadd.f32 %v3627_v28, %v1018_v54 }
 0x2fb   :  { %v1065_v44 = vadd.f32 %v1064_v33, %v1063_v30  ;;  %v1014_v33 = vadd.f32 %v2744_v32, %v3627_v28 }
 0x2fc   :  { %v2750_v36 = vpop.f32.mrb[16].mxu1 }
 0x2fd   :  { %v1067_v19 = vadd.f32 %v1066_v51, %v1065_v44  ;;  %v1028_v49 = vpop.f32.mrb[17].mxu1  ;;  %v2930_v44 = vmov 0  }
 0x2fe   :  { %2770 = vset.pattern.permute.xlu1 %v2930_v44  ;;  %v1029_v32 = vadd.f32 %v3627_v28, %v1028_v49 }
 0x2ff   :  { %v1069_v25 = vadd.f32 %v1068_v12, %v1067_v19  ;;  %1527 = vperm.xlu1 %2770, %v2618_v26   ;;  %v1090_v19 = vsel %vm357_vm1, %v1009_v29, 0.0 }
 0x301   :  { %v1071_v47 = vadd.f32 %v1070_v9, %v1069_v25  ;;  %v1092_v25 = vsel %vm357_vm1, %v1014_v33, 0.0 }
 0x303   :  { %v1073_v38 = vadd.f32 %v1072_v17, %v1071_v47  ;;  %v1094_v47 = vsel %vm357_vm1, %v1019_v61, 0.0 }
 0x305   :  { %v1075_v35 = vadd.f32 %v1074_v22, %v1073_v38  ;;  %v1096_v38 = vsel %vm357_vm1, %v1024_v15, 0.0  ;;  %v1034_v22 = vadd.f32 %v2750_v36, %v3627_v28 }
 0x307   :  { %v1077_v59 = vadd.f32 %v1076_v43, %v1075_v35  ;;  %v1098_v43 = vsel %vm357_vm1, %v1029_v32, 0.0  ;;  %v1100_v54 = vsel %vm357_vm1, %v1034_v22, 0.0 }
 0x309   :  { %v1079_v57 = vadd.f32 %v1078_v39, %v1077_v59 }
 0x30b   :  { %v1081_v50 = vadd.f32 %v1080_v3, %v1079_v57 }
 0x30d   :  { %v1083_v60 = vadd.f32 %v1082_v2, %v1081_v50 }
 0x30f   :  { %v1085_v62 = vadd.f32 %v1084_v24, %v1083_v60 }
 0x311   :  { %v1087_v30 = vadd.f32 %v1086_v13, %v1085_v62 }
 0x313   :  { %v1089_v51 = vadd.f32 %v1088_v52, %v1087_v30 }
 0x315   :  { %v1091_v12 = vadd.f32 %v1090_v19, %v1089_v51 }
 0x317   :  { %v1093_v9 = vadd.f32 %v1092_v25, %v1091_v12 }
 0x319   :  { %v1095_v17 = vadd.f32 %v1094_v47, %v1093_v9 }
 0x31b   :  { %v1097_v35 = vadd.f32 %v1096_v38, %v1095_v17 }
 0x31d   :  { %v1099_v59 = vadd.f32 %v1098_v43, %v1097_v35 }
 0x31f   :  { %v1101_v39 = vadd.f32 %v1100_v54, %v1099_v59 }
 0x321   :  { %v1102_v57 = vrot.slane %v1101_v39, 4 }
 0x323   :  { %v1103_v3 = vadd.f32 %v1102_v57, %v1101_v39 }
 0x325   :  { %v1104_v0 = vrot.slane %v1103_v3, 2 }
 0x327   :  { %v1105_v50 = vadd.f32 %v1104_v0, %v1103_v3 }
 0x329   :  { %v1106_v2 = vrot.slane %v1105_v50, 1 }
 0x32b   :  { %v1107_v60 = vadd.f32 %v1106_v2, %v1105_v50 }
 0x32d   :  { %v3781_v24 = vmul.f32 0.00390625, %v1107_v60 }
 0x32f   :  { %v3785_v49 = vsub.f32 %v3693_v63, %v3781_v24  ;;  %v3789_v28 = vsub.f32 %v3690_v53, %v3781_v24  ;;  %v3793_v36 = vsub.f32 %v3703_v11, %v3781_v24  ;;  %v3797_v62 = vsub.f32 %v3700_v5, %v3781_v24 }
 0x330   :  { %v3800_v13 = vsub.f32 %v999_v34, %v3781_v24  ;;  %v3803_v30 = vsub.f32 %v1004_v40, %v3781_v24  ;;  %v3806_v63 = vsub.f32 %v1009_v29, %v3781_v24  ;;  %v3809_v53 = vsub.f32 %v1014_v33, %v3781_v24 }
 0x331   :  { %v3812_v52 = vsub.f32 %v1019_v61, %v3781_v24  ;;  %v3815_v11 = vsub.f32 %v1024_v15, %v3781_v24  ;;  %v3818_v5 = vsub.f32 %v1029_v32, %v3781_v24  ;;  %v3821_v34 = vsub.f32 %v1034_v22, %v3781_v24 }
 0x332   :  { %v3825_v40 = vsub.f32 %v3635_v4, %v3781_v24  ;;  %v3829_v29 = vsub.f32 %v3632_v8, %v3781_v24  ;;  %v3833_v33 = vsub.f32 %v3649_v10, %v3781_v24  ;;  %v3837_v26 = vsub.f32 %v3646_v20, %v3781_v24 }
 0x333   :  { %v3845_v4 = vsub.f32 %v3661_v46, %v3781_v24  ;;  %v3851_v10 = vsub.f32 %v3658_v37, %v3781_v24  ;;  %v3859_v15 = vsub.f32 %v3673_v21, %v3781_v24  ;;  %v3866_v37 = vsub.f32 %v3670_v45, %v3781_v24 }
 0x334   :  { %v1141_v51 = vmul.f32 %v3825_v40, %v3825_v40  ;;  %v1142_v19 = vmul.f32 %v3829_v29, %v3829_v29  ;;  %v1143_v8 = vmul.f32 %v3833_v33, %v3833_v33  ;;  %v1144_v20 = vmul.f32 %v3837_v26, %v3837_v26 }
 0x335   :  { %v1145_v46 = vmul.f32 %v3845_v4, %v3845_v4  ;;  %v1146_v32 = vmul.f32 %v3851_v10, %v3851_v10  ;;  %v3873_v21 = vsub.f32 %v3683_v41, %v3781_v24  ;;  %v1147_v22 = vmul.f32 %v3859_v15, %v3859_v15 }
 0x336   :  { %v1173_v61 = vsel %vm357_vm1, %v1141_v51, 0.0  ;;  %v1174_v12 = vsel %vm357_vm1, %v1142_v19, 0.0  ;;  %v1176_v9 = vsel %vm357_vm1, %v1143_v8, 0.0  ;;  %v1178_v17 = vsel %vm357_vm1, %v1144_v20, 0.0 }
 0x337   :  { %v1175_v25 = vadd.f32 %v1174_v12, %v1173_v61  ;;  %v1180_v35 = vsel %vm357_vm1, %v1145_v46, 0.0  ;;  %v3880_v45 = vsub.f32 %v3680_v27, %v3781_v24  ;;  %v1148_v59 = vmul.f32 %v3866_v37, %v3866_v37 }
 0x338   :  { %v1182_v54 = vsel %vm357_vm1, %v1146_v32, 0.0  ;;  %v1149_v41 = vmul.f32 %v3873_v21, %v3873_v21  ;;  %v1184_v57 = vsel %vm357_vm1, %v1147_v22, 0.0  ;;  %v1151_v27 = vmul.f32 %v3785_v49, %v3785_v49 }
 0x339   :  { %v1177_v47 = vadd.f32 %v1176_v9, %v1175_v25  ;;  %v1150_v0 = vmul.f32 %v3880_v45, %v3880_v45  ;;  %v1186_v50 = vsel %vm357_vm1, %v1148_v59, 0.0  ;;  %v1152_v19 = vmul.f32 %v3789_v28, %v3789_v28 }
 0x33a   :  { %v1188_v60 = vsel %vm357_vm1, %v1149_v41, 0.0  ;;  %v3899_v61 = vsub.f32 %v3706_v58, %v3781_v24  ;;  %v1153_v12 = vmul.f32 %v3793_v36, %v3793_v36  ;;  %v1192_v25 = vsel %vm357_vm1, %v1151_v27, 0.0 }
 0x33b   :  { %v1179_v38 = vadd.f32 %v1178_v17, %v1177_v47  ;;  %v1190_v8 = vsel %vm357_vm1, %v1150_v0, 0.0  ;;  %v3906_v9 = vsub.f32 %v3712_v31, %v3781_v24  ;;  %v1154_v47 = vmul.f32 %v3797_v62, %v3797_v62 }
 0x33c   :  { %v1194_v32 = vsel %vm357_vm1, %v1152_v19, 0.0  ;;  %v3913_v58 = vsub.f32 %v3720_v55, %v3781_v24  ;;  %v1196_v22 = vsel %vm357_vm1, %v1153_v12, 0.0  ;;  %v3920_v31 = vsub.f32 %v3726_v7, %v3781_v24 }
 0x33d   :  { %v1181_v43 = vadd.f32 %v1180_v35, %v1179_v38  ;;  %v1155_v38 = vmul.f32 %v3899_v61, %v3899_v61  ;;  %v1198_v59 = vsel %vm357_vm1, %v1154_v47, 0.0  ;;  %v3927_v55 = vsub.f32 %v3731_v18, %v3781_v24 }
 0x33e   :  { %v3934_v7 = vsub.f32 %v3737_v1, %v3781_v24  ;;  %v3941_v18 = vsub.f32 %v3742_v42, %v3781_v24  ;;  %v3948_v1 = vsub.f32 %v3748_v48, %v3781_v24  ;;  %v3955_v42 = vsub.f32 %v3753_v56, %v3781_v24 }
 0x33f   :  { %v1183_v39 = vadd.f32 %v1182_v54, %v1181_v43  ;;  %v1156_v43 = vmul.f32 %v3906_v9, %v3906_v9  ;;  %v1200_v41 = vsel %vm357_vm1, %v1155_v38, 0.0  ;;  %v3962_v48 = vsub.f32 %v3758_v6, %v3781_v24 }
 0x340   :  { %v1163_v56 = vmul.f32 %v3955_v42, %v3955_v42  ;;  %v1165_v6 = vmul.f32 %v3800_v13, %v3800_v13 }
 0x341   :  { %v1185_v3 = vadd.f32 %v1184_v57, %v1183_v39  ;;  %v1157_v39 = vmul.f32 %v3913_v58, %v3913_v58  ;;  %v1202_v0 = vsel %vm357_vm1, %v1156_v43, 0.0 }
 0x342   :  { %v1216_v24 = vsel %vm357_vm1, %v1163_v56, 0.0 }
 0x343   :  { %v1187_v2 = vadd.f32 %v1186_v50, %v1185_v3  ;;  %v1158_v3 = vmul.f32 %v3920_v31, %v3920_v31  ;;  %v1204_v27 = vsel %vm357_vm1, %v1157_v39, 0.0 }
 0x345   :  { %v1189_v51 = vadd.f32 %v1188_v60, %v1187_v2  ;;  %v1159_v2 = vmul.f32 %v3927_v55, %v3927_v55  ;;  %v1206_v19 = vsel %vm357_vm1, %v1158_v3, 0.0  ;;  %v1220_v3 = vsel %vm357_vm1, %v1165_v6, 0.0 }
 0x347   :  { %v1191_v20 = vadd.f32 %v1190_v8, %v1189_v51  ;;  %v1160_v51 = vmul.f32 %v3934_v7, %v3934_v7  ;;  %v1208_v12 = vsel %vm357_vm1, %v1159_v2, 0.0 }
 0x349   :  { %v1193_v46 = vadd.f32 %v1192_v25, %v1191_v20  ;;  %v1161_v20 = vmul.f32 %v3941_v18, %v3941_v18  ;;  %v1210_v47 = vsel %vm357_vm1, %v1160_v51, 0.0 }
 0x34b   :  { %v1195_v17 = vadd.f32 %v1194_v32, %v1193_v46  ;;  %v1162_v46 = vmul.f32 %v3948_v1, %v3948_v1 }
 0x34d   :  { %v1197_v35 = vadd.f32 %v1196_v22, %v1195_v17  ;;  %v1212_v17 = vsel %vm357_vm1, %v1161_v20, 0.0  ;;  %v1164_v22 = vmul.f32 %v3962_v48, %v3962_v48 }
 0x34f   :  { %v1199_v54 = vadd.f32 %v1198_v59, %v1197_v35  ;;  %v1214_v35 = vsel %vm357_vm1, %v1162_v46, 0.0  ;;  %v1218_v39 = vsel %vm357_vm1, %v1164_v22, 0.0 }
 0x351   :  { %v1201_v57 = vadd.f32 %v1200_v41, %v1199_v54  ;;  %v1166_v54 = vmul.f32 %v3803_v30, %v3803_v30 }
 0x353   :  { %v1203_v50 = vadd.f32 %v1202_v0, %v1201_v57  ;;  %v1167_v57 = vmul.f32 %v3806_v63, %v3806_v63  ;;  %v1222_v2 = vsel %vm357_vm1, %v1166_v54, 0.0 }
 0x355   :  { %v1205_v60 = vadd.f32 %v1204_v27, %v1203_v50  ;;  %v1168_v50 = vmul.f32 %v3809_v53, %v3809_v53  ;;  %v1224_v51 = vsel %vm357_vm1, %v1167_v57, 0.0 }
 0x357   :  { %v1207_v8 = vadd.f32 %v1206_v19, %v1205_v60  ;;  %v1169_v60 = vmul.f32 %v3812_v52, %v3812_v52  ;;  %v1226_v20 = vsel %vm357_vm1, %v1168_v50, 0.0 }
 0x359   :  { %v1209_v25 = vadd.f32 %v1208_v12, %v1207_v8  ;;  %v1170_v8 = vmul.f32 %v3815_v11, %v3815_v11  ;;  %v1228_v46 = vsel %vm357_vm1, %v1169_v60, 0.0 }
 0x35b   :  { %v1211_v32 = vadd.f32 %v1210_v47, %v1209_v25  ;;  %v1171_v25 = vmul.f32 %v3818_v5, %v3818_v5  ;;  %v1230_v56 = vsel %vm357_vm1, %v1170_v8, 0.0 }
 0x35d   :  { %v1213_v38 = vadd.f32 %v1212_v17, %v1211_v32  ;;  %v1172_v32 = vmul.f32 %v3821_v34, %v3821_v34 }
 0x35f   :  { %v1215_v43 = vadd.f32 %v1214_v35, %v1213_v38  ;;  %v1232_v38 = vsel %vm357_vm1, %v1171_v25, 0.0  ;;  %v1234_v35 = vsel %vm357_vm1, %v1172_v32, 0.0 }
 0x361   :  { %v1217_v59 = vadd.f32 %v1216_v24, %v1215_v43 }
 0x363   :  { %v1219_v41 = vadd.f32 %v1218_v39, %v1217_v59 }
 0x365   :  { %v1221_v0 = vadd.f32 %v1220_v3, %v1219_v41 }
 0x367   :  { %v1223_v27 = vadd.f32 %v1222_v2, %v1221_v0  ;;  %v4006_v2 = vld [vmem:[%s4573_s7] ss:$0 sm:$0xff] }
 0x369   :  { %v1225_v19 = vadd.f32 %v1224_v51, %v1223_v27 }
 0x36b   :  { %v1227_v12 = vadd.f32 %v1226_v20, %v1225_v19 }
 0x36d   :  { %v1229_v47 = vadd.f32 %v1228_v46, %v1227_v12  ;;  %v4040_v46 = vld [vmem:[%s4574_s8] ss:$0 sm:$0xff] }
 0x36f   :  { %v1231_v17 = vadd.f32 %v1230_v56, %v1229_v47 }
 0x371   :  { %v1233_v22 = vadd.f32 %v1232_v38, %v1231_v17 }
 0x373   :  { %v1235_v43 = vadd.f32 %v1234_v35, %v1233_v22 }
 0x375   :  { %v1236_v6 = vrot.slane %v1235_v43, 4 }
 0x377   :  { %v1237_v24 = vadd.f32 %v1236_v6, %v1235_v43 }
 0x379   :  { %v1238_v59 = vrot.slane %v1237_v24, 2 }
 0x37b   :  { %v1239_v54 = vadd.f32 %v1238_v59, %v1237_v24 }
 0x37d   :  { %v1240_v39 = vrot.slane %v1239_v54, 1 }
 0x37f   :  { %v1241_v41 = vadd.f32 %v1240_v39, %v1239_v54 }
 0x381   :  { %v1242_v57 = vmul.f32 0.00390625, %v1241_v41 }
 0x383   :  { %v1243_v3 = vadd.f32 1e-05, %v1242_v57 }
 0x385   :  { %2774 = vrsqrt.f32 %v1243_v3 }
 0x38f   :  { %v3999_v0 = vpop.eup %2774 }
 0x390   :  { %v1259_v50 = vmul.f32 %v3999_v0, %v3899_v61  ;;  %v1245_v27 = vmul.f32 %v3999_v0, %v3825_v40  ;;  %v1246_v60 = vmul.f32 %v3999_v0, %v3829_v29  ;;  %v1247_v51 = vmul.f32 %v3999_v0, %v3833_v33 }
 0x391   :  { %v1256_v19 = vmul.f32 %v3999_v0, %v3789_v28  ;;  %v1248_v61 = vmul.f32 %v3999_v0, %v3837_v26  ;;  %v1261_v8 = vmul.f32 %v3999_v0, %v3913_v58  ;;  %v1271_v20 = vmul.f32 %v3999_v0, %v3806_v63 }
 0x392   :  { %v1273_v40 = vmul.f32 %v3999_v0, %v3812_v52  ;;  %v4025_v29 = vmul.f32 %v4006_v2, %v1259_v50  ;;  %v1283_v33 = vmul.f32 %v4006_v2, %v1245_v27  ;;  %v1284_v12 = vmul.f32 %v4006_v2, %v1246_v60 }
 0x393   :  { %v1285_v28 = vmul.f32 %v4006_v2, %v1247_v51  ;;  %v1294_v26 = vmul.f32 %v4006_v2, %v1256_v19  ;;  %v1249_v58 = vmul.f32 %v3999_v0, %v3845_v4  ;;  %v1263_v63 = vmul.f32 %v3999_v0, %v3927_v55 }
 0x394   :  { %v1286_v25 = vmul.f32 %v4006_v2, %v1248_v61  ;;  %v1299_v52 = vmul.f32 %v4006_v2, %v1261_v8  ;;  %v4043_v47 = vmul.f32 %v4006_v2, %v1271_v20  ;;  %v1250_v32 = vmul.f32 %v3999_v0, %v3851_v10  ;;  %v4061_v10 = vld [vmem:[%s4575_s9] ss:$0 sm:$0xff]  ;;  %s2931_s9 = smov [#allocation3]  }
 0x395   :  { %v1265_v4 = vmul.f32 %v3999_v0, %v3941_v18  ;;  %v4050_v55 = vmul.f32 %v4006_v2, %v1273_v40  ;;  %v1323_v56 = vadd.f32 %v4040_v46, %v1285_v28  ;;  %v1321_v17 = vadd.f32 %v4040_v46, %v1283_v33  ;;  %s2566_s19 = sshll.u32 %s2931_s9, 4  ;;  %s2567_s19 = int_to_ptr.vmem [resolvable:$true] %s2566_s19 }
 0x396   :  { %v1332_v38 = vadd.f32 %v4040_v46, %v1294_v26  ;;  %v1322_v22 = vadd.f32 %v4040_v46, %v1284_v12  ;;  %v1287_v35 = vmul.f32 %v4006_v2, %v1249_v58  ;;  %v1301_v43 = vmul.f32 %v4006_v2, %v1263_v63  ;;  %s2904_s20 = scalar_lea.vmem %s2567_s19, 256  ;;  %p2909_p1 = scmp.lt.s32.totalorder %s2567_s19, %s2567_s19 }
 0x397   :  { %v1337_v18 = vadd.f32 %v4040_v46, %v1299_v52  ;;  %v1324_v6 = vadd.f32 %v4040_v46, %v1286_v25  ;;  %v1355_v24 = vmax.f32 %v1323_v56, 0.0  ;;  %v1353_v59 = vmax.f32 %v1321_v17, 0.0  ;;  %p2905_p0 = scmp.ne.s32.totalorder %s2567_s19, %s2904_s20  ;;  %p2910_p2 = scmp.lt.s32.totalorder %s2904_s20, %s2904_s20 }
 0x398   :  { %v1364_v54 = vmax.f32 %v1332_v38, 0.0  ;;  %v1354_v39 = vmax.f32 %v1322_v22, 0.0  ;;  %v1251_v41 = vmul.f32 %v3999_v0, %v3859_v15  ;;  %v1267_v57 = vmul.f32 %v3999_v0, %v3955_v42 }
 0x399   :  { %v1288_v3 = vmul.f32 %v4006_v2, %v1250_v32  ;;  %v1303_v50 = vmul.f32 %v4006_v2, %v1265_v4  ;;  %v1394_v27 = vmul.f32 %v4061_v10, %v1355_v24  ;;  %v1392_v60 = vmul.f32 %v4061_v10, %v1353_v59  ;;  %p2911_p3 = por %p2910_p2, %p2909_p1 }
 0x39a   :  { %v1369_v51 = vmax.f32 %v1337_v18, 0.0  ;;  %v1356_v19 = vmax.f32 %v1324_v6, 0.0  ;;  %v1339_v61 = vadd.f32 %v4040_v46, %v1301_v43  ;;  %v1325_v8 = vadd.f32 %v4040_v46, %v1287_v35 }
 0x39b   :  { %v1430_v20 = vsel %vm357_vm1, %v1394_v27, 0.0  ;;  %v1424_v15 = vsel %vm357_vm1, %v1392_v60, 0.0  ;;  %v1403_v42 = vmul.f32 %v4061_v10, %v1364_v54  ;;  %v1393_v40 = vmul.f32 %v4061_v10, %v1354_v39  ;;  %p2912_p4 = pnand %p2911_p3, %p2905_p0 }
 0x39c   :  { %1431 = vadd.xlane.f32.xlu0 %v1430_v20  ;;  %1425 = vadd.xlane.f32.xlu1 %v1424_v15  ;;  %v1252_v33 = vmul.f32 %v3999_v0, %v3866_v37  ;;  %v1258_v12 = vmul.f32 %v3999_v0, %v3797_v62  ;;  %v1289_v28 = vmul.f32 %v4006_v2, %v1251_v41  ;;  %v1371_v25 = vmax.f32 %v1339_v61, 0.0 }
 0x39d   :  { %v1305_v26 = vmul.f32 %v4006_v2, %v1267_v57  ;;  %v1408_v58 = vmul.f32 %v4061_v10, %v1369_v51  ;;  %v1395_v63 = vmul.f32 %v4061_v10, %v1356_v19  ;;  %v1357_v52 = vmax.f32 %v1325_v8, 0.0 }
 0x39e   :  { %v1457_v32 = vsel %vm357_vm1, %v1403_v42, 0.0  ;;  %v1427_v4 = vsel %vm357_vm1, %v1393_v40, 0.0  ;;  %v1341_v56 = vadd.f32 %v4040_v46, %v1303_v50  ;;  %v1326_v37 = vadd.f32 %v4040_v46, %v1288_v3 }
 0x39f   :  { %v1253_v62 = vmul.f32 %v3999_v0, %v3873_v21  ;;  %v1270_v17 = vmul.f32 %v3999_v0, %v3803_v30  ;;  %v1290_v38 = vmul.f32 %v4006_v2, %v1252_v33  ;;  %v1296_v22 = vmul.f32 %v4006_v2, %v1258_v12 }
 0x3a0   :  { %1458 = vadd.xlane.f32.xlu0 %v1457_v32  ;;  %1428 = vadd.xlane.f32.xlu1 %v1427_v4  ;;  %v1472_v35 = vsel %vm357_vm1, %v1408_v58, 0.0  ;;  %v1433_v43 = vsel %vm357_vm1, %v1395_v63, 0.0  ;;  %v1410_v18 = vmul.f32 %v4061_v10, %v1371_v25  ;;  %v1396_v6 = vmul.f32 %v4061_v10, %v1357_v52 }
 0x3a1   :  { %v1373_v24 = vmax.f32 %v1341_v56, 0.0  ;;  %v1358_v59 = vmax.f32 %v1326_v37, 0.0  ;;  %v1343_v54 = vadd.f32 %v4040_v46, %v1305_v26  ;;  %v1327_v21 = vadd.f32 %v4040_v46, %v1289_v28 }
 0x3a2   :  { %v1254_v30 = vmul.f32 %v3999_v0, %v3880_v45  ;;  %v1291_v39 = vmul.f32 %v4006_v2, %v1253_v62  ;;  %v1308_v41 = vmul.f32 %v4006_v2, %v1270_v17  ;;  %v1334_v57 = vadd.f32 %v4040_v46, %v1296_v22 }
 0x3a3   :  { %v1260_v3 = vmul.f32 %v3999_v0, %v3906_v9  ;;  %v1478_v50 = vsel %vm357_vm1, %v1410_v18, 0.0  ;;  %v1436_v27 = vsel %vm357_vm1, %v1396_v6, 0.0  ;;  %v1328_v60 = vadd.f32 %v4040_v46, %v1290_v38 }
 0x3a4   :  { %1473 = vadd.xlane.f32.xlu0 %v1472_v35  ;;  %1434 = vadd.xlane.f32.xlu1 %v1433_v43  ;;  %v1412_v51 = vmul.f32 %v4061_v10, %v1373_v24  ;;  %v1397_v19 = vmul.f32 %v4061_v10, %v1358_v59  ;;  %v1375_v45 = vmax.f32 %v1343_v54, 0.0  ;;  %v1359_v61 = vmax.f32 %v1327_v21, 0.0 }
 0x3a5   :  { %v1275_v8 = vmul.f32 %v3999_v0, %v3818_v5  ;;  %v1255_v20 = vmul.f32 %v3999_v0, %v3785_v49  ;;  %v1272_v9 = vmul.f32 %v3999_v0, %v3809_v53  ;;  %v1366_v15 = vmax.f32 %v1334_v57, 0.0 }
 0x3a6   :  { %v1346_v42 = vadd.f32 %v4040_v46, %v1308_v41  ;;  %v1329_v40 = vadd.f32 %v4040_v46, %v1291_v39  ;;  %v1257_v33 = vmul.f32 %v3999_v0, %v3793_v36  ;;  %v1292_v12 = vmul.f32 %v4006_v2, %v1254_v30 }
 0x3a7   :  { %v1298_v5 = vmul.f32 %v4006_v2, %v1260_v3  ;;  %v1360_v28 = vmax.f32 %v1328_v60, 0.0  ;;  %v1484_v49 = vsel %vm357_vm1, %v1412_v51, 0.0  ;;  %v1439_v26 = vsel %vm357_vm1, %v1397_v19, 0.0 }
 0x3a8   :  { %1479 = vadd.xlane.f32.xlu0 %v1478_v50  ;;  %1437 = vadd.xlane.f32.xlu1 %v1436_v27  ;;  %v1414_v58 = vmul.f32 %v4061_v10, %v1375_v45  ;;  %v1398_v53 = vmul.f32 %v4061_v10, %v1359_v61  ;;  %v1262_v63 = vmul.f32 %v3999_v0, %v3920_v31  ;;  %v1378_v4 = vmax.f32 %v1346_v42, 0.0 }
 0x3a9   :  { %v1274_v25 = vmul.f32 %v3999_v0, %v3815_v11  ;;  %v1293_v36 = vmul.f32 %v4006_v2, %v1255_v20  ;;  %v1310_v52 = vmul.f32 %v4006_v2, %v1272_v9  ;;  %v1405_v32 = vmul.f32 %v4061_v10, %v1366_v15 }
 0x3aa   :  { %v1361_v56 = vmax.f32 %v1329_v40, 0.0  ;;  %v1399_v37 = vmul.f32 %v4061_v10, %v1360_v28  ;;  %v1335_v62 = vadd.f32 %v4040_v46, %v4025_v29  ;;  %v1347_v31 = vadd.f32 %v4040_v46, %v4043_v47 }
 0x3ab   :  { %v1349_v11 = vadd.f32 %v4040_v46, %v4050_v55  ;;  %v1490_v17 = vsel %vm357_vm1, %v1414_v58, 0.0  ;;  %v1442_v38 = vsel %vm357_vm1, %v1398_v53, 0.0  ;;  %v1336_v22 = vadd.f32 %v4040_v46, %v1298_v5 }
 0x3ac   :  { %1485 = vadd.xlane.f32.xlu0 %v1484_v49  ;;  %1440 = vadd.xlane.f32.xlu1 %v1439_v26  ;;  %v1330_v35 = vadd.f32 %v4040_v46, %v1292_v12  ;;  %v1295_v43 = vmul.f32 %v4006_v2, %v1257_v33  ;;  %v1367_v18 = vmax.f32 %v1335_v62, 0.0  ;;  %v1379_v29 = vmax.f32 %v1347_v31, 0.0 }
 0x3ad   :  { %v1381_v6 = vmax.f32 %v1349_v11, 0.0  ;;  %v1312_v47 = vmul.f32 %v4006_v2, %v1274_v25  ;;  %v1463_v24 = vsel %vm357_vm1, %v1405_v32, 0.0  ;;  %v1417_v55 = vmul.f32 %v4061_v10, %v1378_v4 }
 0x3ae   :  { %v1400_v59 = vmul.f32 %v4061_v10, %v1361_v56  ;;  %v1445_v54 = vsel %vm357_vm1, %v1399_v37, 0.0  ;;  %v4156_v21 = vmul.f32 %v4061_v10, %v1367_v18  ;;  %v4159_v30 = vmul.f32 %v4061_v10, %v1379_v29 }
 0x3af   :  { %v4162_v39 = vmul.f32 %v4061_v10, %v1381_v6  ;;  %v1368_v41 = vmax.f32 %v1336_v22, 0.0  ;;  %v1362_v57 = vmax.f32 %v1330_v35, 0.0  ;;  %v1348_v3 = vadd.f32 %v4040_v46, %v1310_v52 }
 0x3b0   :  { %1491 = vadd.xlane.f32.xlu0 %v1490_v17  ;;  %1443 = vadd.xlane.f32.xlu1 %v1442_v38  ;;  %v1331_v50 = vadd.f32 %v4040_v46, %v1293_v36  ;;  %v1313_v27 = vmul.f32 %v4006_v2, %v1275_v8  ;;  %v1264_v60 = vmul.f32 %v3999_v0, %v3934_v7  ;;  %v1499_v45 = vsel %vm357_vm1, %v1417_v55, 0.0 }
 0x3b1   :  { %v1276_v51 = vmul.f32 %v3999_v0, %v3821_v34  ;;  %v1300_v19 = vmul.f32 %v4006_v2, %v1262_v63  ;;  %v1448_v61 = vsel %vm357_vm1, %v1400_v59, 0.0  ;;  %v1350_v20 = vadd.f32 %v4040_v46, %v1312_v47 }
 0x3b2   :  { %v1333_v9 = vadd.f32 %v4040_v46, %v1295_v43  ;;  %v1407_v15 = vmul.f32 %v4061_v10, %v1368_v41  ;;  %v1401_v8 = vmul.f32 %v4061_v10, %v1362_v57  ;;  %v1380_v42 = vmax.f32 %v1348_v3, 0.0 }
 0x3b3   :  { %v1363_v40 = vmax.f32 %v1331_v50, 0.0  ;;  %v1266_v34 = vmul.f32 %v3999_v0, %v3948_v1  ;;  %v1302_v7 = vmul.f32 %v4006_v2, %v1264_v60  ;;  %v1314_v33 = vmul.f32 %v4006_v2, %v1276_v51 }
 0x3b4   :  { %1464 = vadd.xlane.f32.xlu0 %v1463_v24  ;;  %1446 = vadd.xlane.f32.xlu1 %v1445_v54  ;;  %v1382_v12 = vmax.f32 %v1350_v20, 0.0  ;;  %v1365_v5 = vmax.f32 %v1333_v9, 0.0  ;;  %v1351_v28 = vadd.f32 %v4040_v46, %v1313_v27  ;;  %v1338_v49 = vadd.f32 %v4040_v46, %v1300_v19  ;;  %v4226_v9 = vpop.permute.xlu1 %1527 }
 0x3b5   :  { %v1469_v26 = vsel %vm357_vm1, %v1407_v15, 0.0  ;;  %v1451_v58 = vsel %vm357_vm1, %v1401_v8, 0.0  ;;  %v1419_v53 = vmul.f32 %v4061_v10, %v1380_v42  ;;  %v1402_v63 = vmul.f32 %v4061_v10, %v1363_v40 }
 0x3b6   :  { %v1268_v1 = vmul.f32 %v3999_v0, %v3962_v48  ;;  %v1304_v25 = vmul.f32 %v4006_v2, %v1266_v34  ;;  %v1421_v36 = vmul.f32 %v4061_v10, %v1382_v12  ;;  %v1404_v52 = vmul.f32 %v4061_v10, %v1365_v5 }
 0x3b7   :  { %v1383_v32 = vmax.f32 %v1351_v28, 0.0  ;;  %v1370_v4 = vmax.f32 %v1338_v49, 0.0  ;;  %v1505_v56 = vsel %vm357_vm1, %v1419_v53, 0.0  ;;  %v1454_v37 = vsel %vm357_vm1, %v1402_v63, 0.0 }
 0x3b8   :  { %1500 = vadd.xlane.f32.xlu0 %v1499_v45  ;;  %1449 = vadd.xlane.f32.xlu1 %v1448_v61  ;;  %v1352_v62 = vadd.f32 %v4040_v46, %v1314_v33  ;;  %v1340_v31 = vadd.f32 %v4040_v46, %v1302_v7  ;;  %v1269_v48 = vmul.f32 %v3999_v0, %v3800_v13  ;;  %v1511_v17 = vsel %vm357_vm1, %v1421_v36, 0.0 }
 0x3b9   :  { %v1306_v11 = vmul.f32 %v4006_v2, %v1268_v1  ;;  %v1422_v38 = vmul.f32 %v4061_v10, %v1383_v32  ;;  %v1409_v22 = vmul.f32 %v4061_v10, %v1370_v4  ;;  %v1460_v35 = vsel %vm357_vm1, %v1404_v52, 0.0 }
 0x3ba   :  { %v1384_v43 = vmax.f32 %v1352_v62, 0.0  ;;  %v1372_v18 = vmax.f32 %v1340_v31, 0.0  ;;  %v1342_v29 = vadd.f32 %v4040_v46, %v1304_v25  ;;  %v1307_v6 = vmul.f32 %v4006_v2, %v1269_v48 }
 0x3bb   :  { %v1514_v13 = vsel %vm357_vm1, %v1422_v38, 0.0  ;;  %v1475_v0 = vsel %vm357_vm1, %v1409_v22, 0.0  ;;  %v1344_v59 = vadd.f32 %v4040_v46, %v1306_v11  ;;  %v1466_v45 = vsel %vm357_vm1, %v4156_v21, 0.0 }
 0x3bc   :  { %1470 = vadd.xlane.f32.xlu0 %v1469_v26  ;;  %1452 = vadd.xlane.f32.xlu1 %v1451_v58  ;;  %v1423_v47 = vmul.f32 %v4061_v10, %v1384_v43  ;;  %v1411_v24 = vmul.f32 %v4061_v10, %v1372_v18  ;;  %v1374_v55 = vmax.f32 %v1342_v29, 0.0  ;;  %v1345_v54 = vadd.f32 %v4040_v46, %v1307_v6 }
 0x3bd   :  { %v1376_v3 = vmax.f32 %v1344_v59, 0.0  ;;  %v1502_v61 = vsel %vm357_vm1, %v4159_v30, 0.0  ;;  %v1508_v20 = vsel %vm357_vm1, %v4162_v39, 0.0  ;;  %v4233_v25 = vand.u32 127, %v141_v14 }
 0x3be   :  { %v1517_v41 = vsel %vm357_vm1, %v1423_v47, 0.0  ;;  %v1481_v57 = vsel %vm357_vm1, %v1411_v24, 0.0  ;;  %v1413_v2 = vmul.f32 %v4061_v10, %v1374_v55  ;;  %v1377_v60 = vmax.f32 %v1345_v54, 0.0 }
 0x3bf   :  { %v1415_v27 = vmul.f32 %v4061_v10, %v1376_v3  ;;  %v1600_v52 = vadd.s32 4294967288, %v4233_v25  ;;  %vm2266_vm10 = vcmp.eq.s32.totalorder %v3022_v16, %v4233_v25 }
 0x3c0   :  { %1506 = vadd.xlane.f32.xlu0 %v1505_v56  ;;  %1455 = vadd.xlane.f32.xlu1 %v1454_v37  ;;  %v1487_v50 = vsel %vm357_vm1, %v1413_v2, 0.0  ;;  %v1416_v19 = vmul.f32 %v4061_v10, %v1377_v60  ;;  %v4245_v37 = vsub.s32 %v4233_v25, %v3022_v16 }
 0x3c1   :  { %v1493_v51 = vsel %vm357_vm1, %v1415_v27, 0.0  ;;  %v4248_v62 = vsub.s32 %v1600_v52, %v3022_v16 }
 0x3c2   :  { %v1496_v46 = vsel %vm357_vm1, %v1416_v19, 0.0 }
 0x3c4   :  { %1512 = vadd.xlane.f32.xlu0 %v1511_v17  ;;  %1461 = vadd.xlane.f32.xlu1 %v1460_v35 }
 0x3c8   :  { %1515 = vadd.xlane.f32.xlu0 %v1514_v13  ;;  %1476 = vadd.xlane.f32.xlu1 %v1475_v0 }
 0x3cc   :  { %1518 = vadd.xlane.f32.xlu0 %v1517_v41  ;;  %1482 = vadd.xlane.f32.xlu1 %v1481_v57 }
 0x3d0   :  { %1488 = vadd.xlane.f32.xlu1 %v1487_v50 }
 0x3d4   :  { %1494 = vadd.xlane.f32.xlu1 %v1493_v51 }
 0x3d8   :  { %1497 = vadd.xlane.f32.xlu1 %v1496_v46 }
 0x3dc   :  { %1467 = vadd.xlane.f32.xlu1 %v1466_v45 }
 0x3e0   :  { %1503 = vadd.xlane.f32.xlu1 %v1502_v61 }
 0x3e4   :  { %1509 = vadd.xlane.f32.xlu1 %v1508_v20 }
 0x429   :  { %v1432_v15 = vpop.xlane.xlu0 %1431  ;;  %v1426_v10 = vpop.xlane.xlu1 %1425 }
 0x42a   :  { %v4251_v14 = vadd.f32 %v4226_v9, %v1432_v15  ;;  %v4257_v48 = vadd.f32 %v4226_v9, %v1426_v10 }
 0x42c   :  { %v1610_v38 = vrot.slane %v4251_v14, %v4245_v37  ;;  %v1599_v13 = vrot.slane %v4257_v48, %v4245_v37 }
 0x42d   :  { %v1459_v8 = vpop.xlane.xlu0 %1458  ;;  %v1429_v42 = vpop.xlane.xlu1 %1428 }
 0x42e   :  { %v4254_v31 = vadd.f32 %v4226_v9, %v1429_v42  ;;  %v4267_v35 = vadd.f32 %v4226_v9, %v1459_v8 }
 0x430   :  { %v1604_v43 = vrot.slane %v4254_v31, %v4248_v62  ;;  %v1650_v27 = vrot.slane %v4267_v35, %v4248_v62 }
 0x431   :  { %v1474_v40 = vpop.xlane.xlu0 %1473  ;;  %v1435_v34 = vpop.xlane.xlu1 %1434 }
 0x432   :  { %v4239_v32 = vadd.f32 %v4226_v9, %v1435_v34  ;;  %v4272_v18 = vadd.f32 %v4226_v9, %v1474_v40  ;;  %v1606_v60 = vsel %vm1605_vm2, %v1604_v43, %v1599_v13 }
 0x434   :  { %v1614_v11 = vrot.slane %v4239_v32, %v4248_v62  ;;  %v1673_v51 = vrot.slane %v4272_v18, %v4245_v37 }
 0x435   :  { %v1438_v7 = vpop.xlane.xlu1 %1437  ;;  %v1480_v33 = vpop.xlane.xlu0 %1479 }
 0x436   :  { %v1615_v0 = vsel %vm1605_vm2, %v1614_v11, %v1610_v38  ;;  %v4283_v47 = vadd.f32 %v4226_v9, %v1438_v7  ;;  %v4289_v59 = vadd.f32 %v4226_v9, %v1480_v33 }
 0x437   :  { %v1743_v46 = vsel %vm1742_vm3, %v1615_v0, %v1606_v60 }
 0x438   :  { %v1619_v45 = vrot.slane %v4283_v47, %v4245_v37  ;;  %v1682_v10 = vrot.slane %v4289_v59, %v4245_v37 }
 0x439   :  { %v1441_v21 = vpop.xlane.xlu1 %1440  ;;  %v1486_v12 = vpop.xlane.xlu0 %1485 }
 0x43a   :  { %v4264_v22 = vadd.f32 %v4226_v9, %v1441_v21  ;;  %v4292_v54 = vadd.f32 %v4226_v9, %v1486_v12 }
 0x43c   :  { %v1623_v2 = vrot.slane %v4264_v22, %v4248_v62  ;;  %v1691_v8 = vrot.slane %v4292_v54, %v4245_v37 }
 0x43d   :  { %v1444_v5 = vpop.xlane.xlu1 %1443  ;;  %v4228_v30 = vpop.xlane.xlu0 %1491 }
 0x43e   :  { %v4295_v41 = vadd.f32 %v4226_v9, %v1444_v5  ;;  %v1624_v7 = vsel %vm1605_vm2, %v1623_v2, %v1619_v45  ;;  %v4341_v5 = vadd.f32 %v4226_v9, %v4228_v30 }
 0x440   :  { %v1628_v42 = vrot.slane %v4295_v41, %v4245_v37 }
 0x441   :  { %v1447_v28 = vpop.xlane.xlu1 %1446  ;;  %v1465_v26 = vpop.xlane.xlu0 %1464 }
 0x442   :  { %v4275_v29 = vadd.f32 %v4226_v9, %v1447_v28  ;;  %v4319_v61 = vadd.f32 %v4226_v9, %v1465_v26 }
 0x444   :  { %v1632_v19 = vrot.slane %v4275_v29, %v4248_v62 }
 0x445   :  { %v1450_v49 = vpop.xlane.xlu1 %1449  ;;  %v4230_v53 = vpop.xlane.xlu0 %1500 }
 0x446   :  { %v4303_v3 = vadd.f32 %v4226_v9, %v1450_v49  ;;  %v1633_v28 = vsel %vm1605_vm2, %v1632_v19, %v1628_v42  ;;  %v4370_v38 = vadd.f32 %v4226_v9, %v4230_v53 }
 0x448   :  { %v1637_v33 = vrot.slane %v4303_v3, %v4245_v37 }
 0x449   :  { %v1453_v39 = vpop.xlane.xlu1 %1452  ;;  %v1471_v1 = vpop.xlane.xlu0 %1470 }
 0x44a   :  { %v4286_v24 = vadd.f32 %v4226_v9, %v1453_v39  ;;  %v4345_v49 = vadd.f32 %v4226_v9, %v1471_v1  ;;  %v1659_v39 = vrot.slane %v4319_v61, %v4248_v62 }
 0x44c   :  { %v1641_v20 = vrot.slane %v4286_v24, %v4248_v62  ;;  %v1668_v0 = vrot.slane %v4345_v49, %v4248_v62 }
 0x44d   :  { %v1456_v58 = vpop.xlane.xlu1 %1455  ;;  %v4241_v56 = vpop.xlane.xlu0 %1506 }
 0x44e   :  { %v4298_v57 = vadd.f32 %v4226_v9, %v1456_v58  ;;  %v1642_v58 = vsel %vm1605_vm2, %v1641_v20, %v1637_v33  ;;  %v4385_v60 = vadd.f32 %v4226_v9, %v4241_v56 }
 0x450   :  { %v1646_v40 = vrot.slane %v4298_v57, %v4245_v37 }
 0x451   :  { %v1462_v63 = vpop.xlane.xlu1 %1461  ;;  %v4277_v6 = vpop.xlane.xlu0 %1512 }
 0x452   :  { %v4306_v50 = vadd.f32 %v4226_v9, %v1462_v63 }
 0x454   :  { %v1655_v21 = vrot.slane %v4306_v50, %v4245_v37 }
 0x455   :  { %v4235_v36 = vpop.xlane.xlu1 %1476  ;;  %v1516_v34 = vpop.xlane.xlu0 %1515 }
 0x456   :  { %v4355_v63 = vadd.f32 %v4226_v9, %v4235_v36  ;;  %v1660_v43 = vsel %vm1605_vm2, %v1659_v39, %v1655_v21  ;;  %v1713_v39 = vrot.slane %v4370_v38, %v4248_v62 }
 0x458   :  { %v1677_v19 = vrot.slane %v4355_v63, %v4248_v62 }
 0x459   :  { %v1483_v4 = vpop.xlane.xlu1 %1482 }
 0x45a   :  { %v4337_v12 = vadd.f32 %v4226_v9, %v1483_v4  ;;  %v1745_v4 = vsel %vm1744_vm4, %v1624_v7, %v1743_v46  ;;  %v1700_v7 = vrot.slane %v4341_v5, %v4245_v37 }
 0x45b   :  { %v1747_v13 = vsel %vm1746_vm5, %v1633_v28, %v1745_v4 }
 0x45c   :  { %v1686_v36 = vrot.slane %v4337_v12, %v4248_v62  ;;  %v1749_v53 = vsel %vm1748_vm6, %v1642_v58, %v1747_v13  ;;  %v4410_v58 = vadd.f32 %v4226_v9, %v4277_v6 }
 0x45d   :  { %v1489_v17 = vpop.xlane.xlu1 %1488 }
 0x45e   :  { %v4348_v26 = vadd.f32 %v4226_v9, %v1489_v17  ;;  %v1651_v17 = vsel %vm1605_vm2, %v1650_v27, %v1646_v40  ;;  %v1687_v21 = vsel %vm1605_vm2, %v1686_v36, %v1682_v10  ;;  %v4418_v10 = vadd.f32 %v4226_v9, %v1516_v34 }
 0x45f   :  { %v1751_v20 = vsel %vm1750_vm7, %v1651_v17, %v1749_v53  ;;  %v1722_v17 = vrot.slane %v4385_v60, %v4248_v62  ;;  %v1678_v36 = vsel %vm1605_vm2, %v1677_v19, %v1673_v51  ;;  %v1731_v51 = vrot.slane %v4410_v58, %v4248_v62 }
 0x460   :  { %v1695_v2 = vrot.slane %v4348_v26, %v4248_v62  ;;  %v1753_v56 = vsel %vm1752_vm8, %v1660_v43, %v1751_v20  ;;  %v1756_v6 = vsel %vm1742_vm3, %v1687_v21, %v1678_v36  ;;  %v1736_v19 = vrot.slane %v4418_v10, %v4245_v37 }
 0x461   :  { %v1495_v55 = vpop.xlane.xlu1 %1494  ;;  %v1823_v36 = vsub.s32 2, %v3022_v16 }
 0x462   :  { %v4358_v30 = vadd.f32 %v4226_v9, %v1495_v55  ;;  %v1519_v55 = vpop.xlane.xlu0 %1518 }
 0x463   :  { %v4402_v33 = vadd.f32 %v4226_v9, %v1519_v55 }
 0x464   :  { %v1704_v46 = vrot.slane %v4358_v30, %v4248_v62 }
 0x465   :  { %v1498_v15 = vpop.xlane.xlu1 %1497  ;;  %v1740_v55 = vrot.slane %v4402_v33, %v4248_v62 }
 0x466   :  { %v4362_v1 = vadd.f32 %v4226_v9, %v1498_v15  ;;  %v1705_v43 = vsel %vm1605_vm2, %v1704_v46, %v1700_v7 }
 0x467   :  { %v1741_v20 = vsel %vm1605_vm2, %v1740_v55, %v1736_v19 }
 0x468   :  { %v1709_v15 = vrot.slane %v4362_v1, %v4245_v37 }
 0x469   :  { %v1468_v52 = vpop.xlane.xlu1 %1467 }
 0x46a   :  { %v4365_v11 = vadd.f32 %v4226_v9, %v1468_v52  ;;  %v1696_v52 = vsel %vm1605_vm2, %v1695_v2, %v1691_v8 }
 0x46b   :  { %v1757_v2 = vsel %vm1744_vm4, %v1696_v52, %v1756_v6 }
 0x46c   :  { %v1664_v27 = vrot.slane %v4365_v11, %v4245_v37 }
 0x46d   :  { %v1504_v45 = vpop.xlane.xlu1 %1503 }
 0x46e   :  { %v4395_v42 = vadd.f32 %v4226_v9, %v1504_v45  ;;  %v1669_v40 = vsel %vm1605_vm2, %v1668_v0, %v1664_v27  ;;  %v1714_v0 = vsel %vm1605_vm2, %v1713_v39, %v1709_v15  ;;  %v1758_v27 = vsel %vm1746_vm5, %v1705_v43, %v1757_v2 }
 0x46f   :  { %v1755_v28 = vsel %vm1754_vm9, %v1669_v40, %v1753_v56  ;;  %v1867_v56 = vsub.s32 6, %v3022_v16  ;;  %v1878_v39 = vsub.s32 7, %v3022_v16 }
 0x470   :  { %v1718_v4 = vrot.slane %v4395_v42, %v4245_v37  ;;  %1765 = vxpose.xlu0.b32.start [1/2] (short) (narrow) %v1755_v28, 16 }
 0x471   :  { %v1510_v13 = vpop.xlane.xlu1 %1509 }
 0x472   :  { %v4425_v8 = vadd.f32 %v4226_v9, %v1510_v13  ;;  %v1723_v34 = vsel %vm1605_vm2, %v1722_v17, %v1718_v4  ;;  %v1759_v9 = vsel %vm1748_vm6, %v1714_v0, %v1758_v27  ;;  %v1812_v17 = vsub.s32 1, %v3022_v16 }
 0x473   :  { %v1760_v45 = vsel %vm1750_vm7, %v1723_v34, %v1759_v9  ;;  %v1856_v13 = vsub.s32 5, %v3022_v16  ;;  %v1834_v34 = vsub.s32 3, %v3022_v16  ;;  %v1845_v27 = vsub.s32 4, %v3022_v16 }
 0x474   :  { %v1727_v53 = vrot.slane %v4425_v8, %v4245_v37 }
 0x476   :  { %v1732_v46 = vsel %vm1605_vm2, %v1731_v51, %v1727_v53 }
 0x477   :  { %v1761_v15 = vsel %vm1752_vm8, %v1732_v46, %v1760_v45 }
 0x478   :  { %v1762_v40 = vsel %vm1754_vm9, %v1741_v20, %v1761_v15 }
 0x479   :  { %1766 = vxpose.xlu0.b32.end [2/2] (short) (narrow) %v1762_v40, 16 }
 0x4a2   :  { %2771 = vset.pattern.permute.xlu0 %v2930_v44 }
 0x4f5   :  { %v1781_v7 = vpop.trf.xlu0 }
 0x4f6   :  { %v1868_v21 = vrot.slane %v1781_v7, %v1867_v56  ;;  %v1802_v28 = vrot.slane %v1781_v7, %v3034_v23  ;;  %v1879_v4 = vrot.slane %v1781_v7, %v1878_v39  ;;  %v1813_v44 = vrot.slane %v1781_v7, %v1812_v17 }
 0x4f7   :  { %v1824_v55 = vrot.slane %v1781_v7, %v1823_v36  ;;  %v1835_v51 = vrot.slane %v1781_v7, %v1834_v34  ;;  %v1846_v53 = vrot.slane %v1781_v7, %v1845_v27  ;;  %v1857_v19 = vrot.slane %v1781_v7, %v1856_v13 }
 0x4f8   :  { %1870 = vbcast.lane.b32.xlu0 %v1868_v21, 256  ;;  %1804 = vbcast.lane.b32.xlu1 %v1802_v28, 256 }
 0x4f9   :  { %v1782_v52 = vpop.trf.xlu0 }
 0x4fa   :  { %v1912_v43 = vrot.slane %v1782_v52, %v1823_v36  ;;  %v1945_v6 = vrot.slane %v1782_v52, %v1856_v13  ;;  %v1956_v0 = vrot.slane %v1782_v52, %v1867_v56  ;;  %v1967_v2 = vrot.slane %v1782_v52, %v1878_v39 }
 0x4fb   :  { %v1890_v9 = vrot.slane %v1782_v52, %v3034_v23  ;;  %v1901_v46 = vrot.slane %v1782_v52, %v1812_v17  ;;  %v1923_v45 = vrot.slane %v1782_v52, %v1834_v34  ;;  %v1934_v20 = vrot.slane %v1782_v52, %v1845_v27 }
 0x4fc   :  { %1881 = vbcast.lane.b32.xlu0 %v1879_v4, 256  ;;  %1808 = vbcast.lane.b32.xlu1 %v1802_v28, 264 }
 0x500   :  { %1815 = vbcast.lane.b32.xlu1 %v1813_v44, 256  ;;  %1918 = vbcast.lane.b32.xlu0 %v1912_v43, 264 }
 0x504   :  { %1819 = vbcast.lane.b32.xlu1 %v1813_v44, 264  ;;  %1947 = vbcast.lane.b32.xlu0 %v1945_v6, 256 }
 0x508   :  { %1826 = vbcast.lane.b32.xlu1 %v1824_v55, 256  ;;  %1958 = vbcast.lane.b32.xlu0 %v1956_v0, 256 }
 0x50c   :  { %1830 = vbcast.lane.b32.xlu1 %v1824_v55, 264  ;;  %1969 = vbcast.lane.b32.xlu0 %v1967_v2, 256 }
 0x510   :  { %1837 = vbcast.lane.b32.xlu1 %v1835_v51, 256 }
 0x514   :  { %1841 = vbcast.lane.b32.xlu1 %v1835_v51, 264 }
 0x518   :  { %1848 = vbcast.lane.b32.xlu1 %v1846_v53, 256 }
 0x51c   :  { %1852 = vbcast.lane.b32.xlu1 %v1846_v53, 264 }
 0x520   :  { %1859 = vbcast.lane.b32.xlu1 %v1857_v19, 256 }
 0x524   :  { %1863 = vbcast.lane.b32.xlu1 %v1857_v19, 264 }
 0x528   :  { %1874 = vbcast.lane.b32.xlu1 %v1868_v21, 264 }
 0x52c   :  { %1885 = vbcast.lane.b32.xlu1 %v1879_v4, 264 }
 0x530   :  { %1892 = vbcast.lane.b32.xlu1 %v1890_v9, 256 }
 0x534   :  { %1896 = vbcast.lane.b32.xlu1 %v1890_v9, 264 }
 0x538   :  { %1903 = vbcast.lane.b32.xlu1 %v1901_v46, 256 }
 0x53c   :  { %1907 = vbcast.lane.b32.xlu1 %v1901_v46, 264 }
 0x540   :  { %1914 = vbcast.lane.b32.xlu1 %v1912_v43, 256 }
 0x544   :  { %1925 = vbcast.lane.b32.xlu1 %v1923_v45, 256 }
 0x548   :  { %1929 = vbcast.lane.b32.xlu1 %v1923_v45, 264 }
 0x54c   :  { %1936 = vbcast.lane.b32.xlu1 %v1934_v20, 256 }
 0x550   :  { %1940 = vbcast.lane.b32.xlu1 %v1934_v20, 264 }
 0x554   :  { %1951 = vbcast.lane.b32.xlu1 %v1945_v6, 264 }
 0x558   :  { %1962 = vbcast.lane.b32.xlu1 %v1956_v0, 264 }
 0x55c   :  { %1973 = vbcast.lane.b32.xlu1 %v1967_v2, 264 }
 0x56a   :  { %v1805_v15 = vpop.permute.xlu1 %1804 }
 0x56b   :  { %v2007_v40 = vadd.f32 %v1805_v15, %v4257_v48  ;;  %v1871_v15 = vpop.permute.xlu0 %1870 }
 0x56d   :  { %v2619_v56 = vmul.f32 -0.5, %v2007_v40 }
 0x56e   :  { %v1809_v23 = vpop.permute.xlu1 %1808 }
 0x56f   :  { %v2103_v7 = vmul.f32 1.442695, %v2619_v56  ;;  %v2008_v21 = vadd.f32 %v1809_v23, %v4254_v31 }
 0x571   :  { %2776 = vpow2.f32 %v2103_v7  ;;  %v2620_v28 = vmul.f32 -0.5, %v2008_v21 }
 0x572   :  { %v1816_v39 = vpop.permute.xlu1 %1815 }
 0x573   :  { %v2105_v4 = vmul.f32 1.442695, %v2620_v28  ;;  %v2009_v17 = vadd.f32 %v1816_v39, %v4251_v14  ;;  %v2019_v28 = vadd.f32 %v1871_v15, %v4306_v50 }
 0x575   :  { %2778 = vpow2.f32 %v2105_v4  ;;  %v2621_v52 = vmul.f32 -0.5, %v2009_v17 }
 0x576   :  { %v1820_v36 = vpop.permute.xlu1 %1819 }
 0x577   :  { %v2107_v43 = vmul.f32 1.442695, %v2621_v52  ;;  %v2010_v44 = vadd.f32 %v1820_v36, %v4239_v32 }
 0x579   :  { %2780 = vpow2.f32 %v2107_v43  ;;  %v2622_v13 = vmul.f32 -0.5, %v2010_v44  ;;  %v1882_v43 = vpop.permute.xlu0 %1881 }
 0x57a   :  { %v1827_v48 = vpop.permute.xlu1 %1826  ;;  %v2021_v50 = vadd.f32 %v1882_v43, %v4365_v11 }
 0x57b   :  { %v2777_v6 = vpop.eup %2776  ;;  %v2109_v0 = vmul.f32 1.442695, %v2622_v13  ;;  %v2011_v55 = vadd.f32 %v1827_v48, %v4283_v47  ;;  %v2631_v13 = vmul.f32 -0.5, %v2019_v28 }
 0x57c   :  { %v2167_v31 = vadd.f32 1.0, %v2777_v6 }
 0x57d   :  { %2782 = vpow2.f32 %v2109_v0  ;;  %v2623_v2 = vmul.f32 -0.5, %v2011_v55 }
 0x57e   :  { %2784 = vrcp.f32 %v2167_v31  ;;  %v1831_v34 = vpop.permute.xlu1 %1830 }
 0x57f   :  { %v2779_v51 = vpop.eup %2778  ;;  %v2111_v14 = vmul.f32 1.442695, %v2623_v2  ;;  %v2012_v27 = vadd.f32 %v1831_v34, %v4264_v22  ;;  %v2127_v34 = vmul.f32 1.442695, %v2631_v13 }
 0x580   :  { %v2168_v53 = vadd.f32 1.0, %v2779_v51 }
 0x581   :  { %2786 = vpow2.f32 %v2111_v14  ;;  %v2624_v19 = vmul.f32 -0.5, %v2012_v27  ;;  %v2633_v27 = vmul.f32 -0.5, %v2021_v50  ;;  %v1919_v50 = vpop.permute.xlu0 %1918 }
 0x582   :  { %2788 = vrcp.f32 %v2168_v53  ;;  %v1838_v32 = vpop.permute.xlu1 %1837 }
 0x583   :  { %v2781_v9 = vpop.eup %2780  ;;  %v2113_v46 = vmul.f32 1.442695, %v2624_v19  ;;  %v2013_v45 = vadd.f32 %v1838_v32, %v4295_v41 }
 0x584   :  { %v2169_v20 = vadd.f32 1.0, %v2781_v9 }
 0x585   :  { %2790 = vpow2.f32 %v2113_v46  ;;  %v2625_v47 = vmul.f32 -0.5, %v2013_v45  ;;  %v2131_v46 = vmul.f32 1.442695, %v2633_v27 }
 0x586   :  { %2792 = vrcp.f32 %v2169_v20  ;;  %v1842_v40 = vpop.permute.xlu1 %1841 }
 0x587   :  { %v2783_v56 = vpop.eup %2782  ;;  %v2115_v23 = vmul.f32 1.442695, %v2625_v47  ;;  %v2014_v7 = vadd.f32 %v1842_v40, %v4275_v29 }
 0x588   :  { %v2785_v22 = vpop.eup %2784  ;;  %v2170_v21 = vadd.f32 1.0, %v2783_v56 }
 0x589   :  { %2794 = vpow2.f32 %v2115_v23  ;;  %v2626_v39 = vmul.f32 -0.5, %v2014_v7  ;;  %2301 = vperm.xlu0 %2771, %v2785_v22  }
 0x58a   :  { %2796 = vrcp.f32 %v2170_v21  ;;  %v1849_v4 = vpop.permute.xlu1 %1848 }
 0x58b   :  { %v2787_v41 = vpop.eup %2786  ;;  %v2117_v17 = vmul.f32 1.442695, %v2626_v39  ;;  %v2015_v52 = vadd.f32 %v1849_v4, %v4303_v3 }
 0x58c   :  { %v2789_v36 = vpop.eup %2788  ;;  %v2171_v44 = vadd.f32 1.0, %v2787_v41 }
 0x58d   :  { %v2627_v48 = vmul.f32 -0.5, %v2015_v52  ;;  %2304 = vperm.xlu1 %2770, %v2789_v36  }
 0x58e   :  { %2798 = vrcp.f32 %v2171_v44  ;;  %v1853_v29 = vpop.permute.xlu1 %1852 }
 0x58f   :  { %v2791_v6 = vpop.eup %2790  ;;  %2800 = vpow2.f32 %v2117_v17  ;;  %v2119_v0 = vmul.f32 1.442695, %v2627_v48  ;;  %v2016_v55 = vadd.f32 %v1853_v29, %v4286_v24 }
 0x590   :  { %v2793_v31 = vpop.eup %2792  ;;  %v2172_v2 = vadd.f32 1.0, %v2791_v6 }
 0x591   :  { %v2628_v51 = vmul.f32 -0.5, %v2016_v55  ;;  %2307 = vperm.xlu1 %2770, %v2793_v31  }
 0x592   :  { %2802 = vrcp.f32 %v2172_v2  ;;  %v1860_v3 = vpop.permute.xlu1 %1859 }
 0x593   :  { %v2795_v14 = vpop.eup %2794  ;;  %2804 = vpow2.f32 %v2119_v0  ;;  %v2121_v53 = vmul.f32 1.442695, %v2628_v51  ;;  %v2017_v19 = vadd.f32 %v1860_v3, %v4298_v57  ;;  %v2028_v51 = vadd.f32 %v1919_v50, %v4348_v26 }
 0x594   :  { %v2797_v32 = vpop.eup %2796  ;;  %v2173_v9 = vadd.f32 1.0, %v2795_v14  ;;  %2806 = vpow2.f32 %v2127_v34 }
 0x595   :  { %v2629_v11 = vmul.f32 -0.5, %v2017_v19  ;;  %2310 = vperm.xlu0 %2771, %v2797_v32  }
 0x596   :  { %2808 = vrcp.f32 %v2173_v9  ;;  %v1864_v24 = vpop.permute.xlu1 %1863 }
 0x597   :  { %2810 = vpow2.f32 %v2121_v53  ;;  %v2123_v45 = vmul.f32 1.442695, %v2629_v11  ;;  %v2018_v20 = vadd.f32 %v1864_v24, %v4267_v35  ;;  %v2640_v11 = vmul.f32 -0.5, %v2028_v51 }
 0x598   :  { %v2799_v47 = vpop.eup %2798 }
 0x599   :  { %v2801_v15 = vpop.eup %2800  ;;  %2812 = vpow2.f32 %v2123_v45  ;;  %v2630_v40 = vmul.f32 -0.5, %v2018_v20  ;;  %2313 = vperm.xlu1 %2770, %v2799_v47  }
 0x59a   :  { %v2174_v56 = vadd.f32 1.0, %v2801_v15  ;;  %v1875_v23 = vpop.permute.xlu1 %1874  ;;  %2814 = vpow2.f32 %v2131_v46  ;;  %v2145_v15 = vmul.f32 1.442695, %v2640_v11 }
 0x59b   :  { %v2125_v57 = vmul.f32 1.442695, %v2630_v40  ;;  %v2020_v7 = vadd.f32 %v1875_v23, %v4319_v61 }
 0x59c   :  { %v2803_v22 = vpop.eup %2802  ;;  %2816 = vrcp.f32 %v2174_v56 }
 0x59d   :  { %v2805_v21 = vpop.eup %2804  ;;  %2818 = vpow2.f32 %v2125_v57  ;;  %v2632_v28 = vmul.f32 -0.5, %v2020_v7  ;;  %2316 = vperm.xlu0 %2771, %v2803_v22   ;;  %v1948_v7 = vpop.permute.xlu0 %1947 }
 0x59e   :  { %v2175_v39 = vadd.f32 1.0, %v2805_v21  ;;  %v1886_v4 = vpop.permute.xlu1 %1885  ;;  %v2807_v35 = vpop.eup %2806 }
 0x59f   :  { %v2129_v41 = vmul.f32 1.442695, %v2632_v28  ;;  %v2022_v17 = vadd.f32 %v1886_v4, %v4345_v49  ;;  %v2179_v6 = vadd.f32 1.0, %v2807_v35 }
 0x5a0   :  { %v2809_v52 = vpop.eup %2808  ;;  %2820 = vrcp.f32 %v2175_v39 }
 0x5a1   :  { %v2811_v36 = vpop.eup %2810  ;;  %2822 = vpow2.f32 %v2129_v41  ;;  %v2634_v43 = vmul.f32 -0.5, %v2022_v17  ;;  %2319 = vperm.xlu1 %2770, %v2809_v52  }
 0x5a2   :  { %v2176_v44 = vadd.f32 1.0, %v2811_v36  ;;  %v1893_v61 = vpop.permute.xlu1 %1892 }
 0x5a3   :  { %v2813_v13 = vpop.eup %2812  ;;  %v2133_v48 = vmul.f32 1.442695, %v2634_v43  ;;  %v2023_v29 = vadd.f32 %v1893_v61, %v4272_v18  ;;  %v2033_v43 = vadd.f32 %v1948_v7, %v4395_v42 }
 0x5a4   :  { %2824 = vrcp.f32 %v2176_v44  ;;  %v2177_v0 = vadd.f32 1.0, %v2813_v13  ;;  %v2815_v55 = vpop.eup %2814  ;;  %v1959_v44 = vpop.permute.xlu0 %1958 }
 0x5a5   :  { %2826 = vpow2.f32 %v2133_v48  ;;  %v2635_v31 = vmul.f32 -0.5, %v2023_v29  ;;  %v2181_v27 = vadd.f32 1.0, %v2815_v55  ;;  %v2035_v42 = vadd.f32 %v1959_v44, %v4425_v8 }
 0x5a6   :  { %v2817_v49 = vpop.eup %2816  ;;  %2828 = vrcp.f32 %v2177_v0  ;;  %v1897_v2 = vpop.permute.xlu1 %1896  ;;  %v2645_v0 = vmul.f32 -0.5, %v2033_v43 }
 0x5a7   :  { %v2819_v34 = vpop.eup %2818  ;;  %v2135_v3 = vmul.f32 1.442695, %v2635_v31  ;;  %2322 = vperm.xlu0 %2771, %v2817_v49   ;;  %v2024_v14 = vadd.f32 %v1897_v2, %v4355_v63  ;;  %2830 = vrcp.f32 %v2179_v6 }
 0x5a8   :  { %v2178_v18 = vadd.f32 1.0, %v2819_v34  ;;  %v1970_v51 = vpop.permute.xlu0 %1969 }
 0x5a9   :  { %2832 = vpow2.f32 %v2135_v3  ;;  %v2636_v53 = vmul.f32 -0.5, %v2024_v14 }
 0x5aa   :  { %v2821_v19 = vpop.eup %2820  ;;  %2834 = vrcp.f32 %v2178_v18  ;;  %v1904_v32 = vpop.permute.xlu1 %1903 }
 0x5ab   :  { %v2823_v9 = vpop.eup %2822  ;;  %v2137_v24 = vmul.f32 1.442695, %v2636_v53  ;;  %2325 = vperm.xlu1 %2770, %v2821_v19   ;;  %v2025_v46 = vadd.f32 %v1904_v32, %v4289_v59  ;;  %2836 = vrcp.f32 %v2181_v27  ;;  %v2155_v27 = vmul.f32 1.442695, %v2645_v0 }
 0x5ac   :  { %v2180_v26 = vadd.f32 1.0, %v2823_v9  ;;  %v2647_v9 = vmul.f32 -0.5, %v2035_v42 }
 0x5ad   :  { %2838 = vpow2.f32 %v2137_v24  ;;  %v2637_v45 = vmul.f32 -0.5, %v2025_v46 }
 0x5ae   :  { %v2825_v20 = vpop.eup %2824  ;;  %2840 = vrcp.f32 %v2180_v26  ;;  %v1908_v63 = vpop.permute.xlu1 %1907 }
 0x5af   :  { %v2827_v47 = vpop.eup %2826  ;;  %v2139_v40 = vmul.f32 1.442695, %v2637_v45  ;;  %2328 = vperm.xlu0 %2771, %v2825_v20   ;;  %v2026_v56 = vadd.f32 %v1908_v63, %v4337_v12  ;;  %v2159_v63 = vmul.f32 1.442695, %v2647_v9 }
 0x5b0   :  { %v2829_v23 = vpop.eup %2828  ;;  %v2182_v57 = vadd.f32 1.0, %v2827_v47 }
 0x5b1   :  { %2842 = vpow2.f32 %v2139_v40  ;;  %v2638_v22 = vmul.f32 -0.5, %v2026_v56  ;;  %2331 = vperm.xlu1 %2770, %v2829_v23   ;;  %v2831_v59 = vpop.eup %2830 }
 0x5b2   :  { %2844 = vrcp.f32 %v2182_v57  ;;  %v1915_v21 = vpop.permute.xlu1 %1914 }
 0x5b3   :  { %v2833_v28 = vpop.eup %2832  ;;  %2846 = vpow2.f32 %v2145_v15  ;;  %v2141_v39 = vmul.f32 1.442695, %v2638_v22  ;;  %v2027_v4 = vadd.f32 %v1915_v21, %v4292_v54 }
 0x5b4   :  { %v2835_v35 = vpop.eup %2834  ;;  %v2183_v41 = vadd.f32 1.0, %v2833_v28 }
 0x5b5   :  { %2848 = vpow2.f32 %v2141_v39  ;;  %v2639_v17 = vmul.f32 -0.5, %v2027_v4  ;;  %2334 = vperm.xlu0 %2771, %v2835_v35   ;;  %2337 = vperm.xlu1 %2770, %v2831_v59   ;;  %v2837_v12 = vpop.eup %2836 }
 0x5b6   :  { %2850 = vrcp.f32 %v2183_v41  ;;  %v1926_v52 = vpop.permute.xlu1 %1925 }
 0x5b7   :  { %v2839_v36 = vpop.eup %2838  ;;  %v2143_v61 = vmul.f32 1.442695, %v2639_v17  ;;  %v2029_v13 = vadd.f32 %v1926_v52, %v4341_v5 }
 0x5b8   :  { %v2841_v48 = vpop.eup %2840  ;;  %v2184_v29 = vadd.f32 1.0, %v2839_v36 }
 0x5b9   :  { %2852 = vpow2.f32 %v2143_v61  ;;  %v2641_v54 = vmul.f32 -0.5, %v2029_v13  ;;  %2340 = vperm.xlu0 %2771, %v2841_v48   ;;  %2343 = vperm.xlu1 %2770, %v2837_v12  }
 0x5ba   :  { %2854 = vrcp.f32 %v2184_v29  ;;  %v1930_v6 = vpop.permute.xlu1 %1929 }
 0x5bb   :  { %v2843_v50 = vpop.eup %2842  ;;  %v2147_v55 = vmul.f32 1.442695, %v2641_v54  ;;  %v2030_v31 = vadd.f32 %v1930_v6, %v4358_v30  ;;  %v2037_v30 = vadd.f32 %v1970_v51, %v4418_v10 }
 0x5bc   :  { %v2845_v49 = vpop.eup %2844  ;;  %v2185_v2 = vadd.f32 1.0, %v2843_v50 }
 0x5bd   :  { %v2847_v34 = vpop.eup %2846  ;;  %2856 = vpow2.f32 %v2147_v55  ;;  %v2642_v5 = vmul.f32 -0.5, %v2030_v31  ;;  %2346 = vperm.xlu0 %2771, %v2845_v49  }
 0x5be   :  { %2858 = vrcp.f32 %v2185_v2  ;;  %v1937_v3 = vpop.permute.xlu1 %1936  ;;  %v2188_v32 = vadd.f32 1.0, %v2847_v34 }
 0x5bf   :  { %v2849_v14 = vpop.eup %2848  ;;  %v2149_v18 = vmul.f32 1.442695, %v2642_v5  ;;  %v2031_v53 = vadd.f32 %v1937_v3, %v4362_v1  ;;  %v2649_v1 = vmul.f32 -0.5, %v2037_v30 }
 0x5c0   :  { %v2851_v19 = vpop.eup %2850  ;;  %v2186_v11 = vadd.f32 1.0, %v2849_v14 }
 0x5c1   :  { %2860 = vpow2.f32 %v2149_v18  ;;  %v2643_v8 = vmul.f32 -0.5, %v2031_v53  ;;  %2349 = vperm.xlu1 %2770, %v2851_v19   ;;  %v2163_v7 = vmul.f32 1.442695, %v2649_v1 }
 0x5c2   :  { %2862 = vrcp.f32 %v2186_v11  ;;  %v1941_v24 = vpop.permute.xlu1 %1940 }
 0x5c3   :  { %v2853_v46 = vpop.eup %2852  ;;  %2864 = vpow2.f32 %v2155_v27  ;;  %v2151_v26 = vmul.f32 1.442695, %v2643_v8  ;;  %v2032_v45 = vadd.f32 %v1941_v24, %v4370_v38 }
 0x5c4   :  { %v2855_v20 = vpop.eup %2854  ;;  %2866 = vrcp.f32 %v2188_v32  ;;  %v2187_v47 = vadd.f32 1.0, %v2853_v46 }
 0x5c5   :  { %2868 = vpow2.f32 %v2151_v26  ;;  %v2644_v15 = vmul.f32 -0.5, %v2032_v45  ;;  %2352 = vperm.xlu0 %2771, %v2855_v20  }
 0x5c6   :  { %2870 = vrcp.f32 %v2187_v47  ;;  %v1952_v10 = vpop.permute.xlu1 %1951 }
 0x5c7   :  { %v2857_v40 = vpop.eup %2856  ;;  %v2153_v56 = vmul.f32 1.442695, %v2644_v15  ;;  %v2034_v23 = vadd.f32 %v1952_v10, %v4385_v60  ;;  %2872 = vpow2.f32 %v2159_v63 }
 0x5c8   :  { %v2859_v57 = vpop.eup %2858  ;;  %v2189_v22 = vadd.f32 1.0, %v2857_v40 }
 0x5c9   :  { %2874 = vpow2.f32 %v2153_v56  ;;  %v2646_v38 = vmul.f32 -0.5, %v2034_v23  ;;  %2355 = vperm.xlu1 %2770, %v2859_v57  }
 0x5ca   :  { %2876 = vrcp.f32 %v2189_v22  ;;  %v1963_v59 = vpop.permute.xlu1 %1962 }
 0x5cb   :  { %v2861_v21 = vpop.eup %2860  ;;  %v2157_v28 = vmul.f32 1.442695, %v2646_v38  ;;  %v2036_v39 = vadd.f32 %v1963_v59, %v4410_v58  ;;  %2878 = vpow2.f32 %v2163_v7 }
 0x5cc   :  { %v2863_v4 = vpop.eup %2862  ;;  %v2190_v35 = vadd.f32 1.0, %v2861_v21 }
 0x5cd   :  { %v2865_v41 = vpop.eup %2864  ;;  %2880 = vpow2.f32 %v2157_v28  ;;  %v2648_v17 = vmul.f32 -0.5, %v2036_v39  ;;  %2358 = vperm.xlu0 %2771, %v2863_v4  }
 0x5ce   :  { %v2867_v60 = vpop.eup %2866  ;;  %2882 = vrcp.f32 %v2190_v35  ;;  %v1974_v12 = vpop.permute.xlu1 %1973  ;;  %v2193_v61 = vadd.f32 1.0, %v2865_v41 }
 0x5cf   :  { %v2869_v52 = vpop.eup %2868  ;;  %v2161_v36 = vmul.f32 1.442695, %v2648_v17  ;;  %v2038_v43 = vadd.f32 %v1974_v12, %v4402_v33 }
 0x5d0   :  { %v2871_v44 = vpop.eup %2870  ;;  %v2191_v13 = vadd.f32 1.0, %v2869_v52 }
 0x5d1   :  { %2884 = vpow2.f32 %v2161_v36  ;;  %v2650_v48 = vmul.f32 -0.5, %v2038_v43  ;;  %2361 = vperm.xlu1 %2770, %v2871_v44   ;;  %2364 = vperm.xlu0 %2771, %v2867_v60   ;;  %v2873_v58 = vpop.eup %2872 }
 0x5d2   :  { %2886 = vrcp.f32 %v2191_v13  ;;  %v2195_v0 = vadd.f32 1.0, %v2873_v58 }
 0x5d3   :  { %v2875_v29 = vpop.eup %2874  ;;  %v2165_v54 = vmul.f32 1.442695, %v2650_v48  ;;  %2888 = vrcp.f32 %v2193_v61 }
 0x5d4   :  { %v2877_v6 = vpop.eup %2876  ;;  %v2192_v50 = vadd.f32 1.0, %v2875_v29 }
 0x5d5   :  { %2890 = vpow2.f32 %v2165_v54  ;;  %2367 = vperm.xlu1 %2770, %v2877_v6   ;;  %v2879_v55 = vpop.eup %2878 }
 0x5d6   :  { %2892 = vrcp.f32 %v2192_v50  ;;  %v2197_v42 = vadd.f32 1.0, %v2879_v55 }
 0x5d7   :  { %v2881_v33 = vpop.eup %2880  ;;  %2894 = vrcp.f32 %v2195_v0 }
 0x5d8   :  { %v2883_v31 = vpop.eup %2882  ;;  %v2194_v49 = vadd.f32 1.0, %v2881_v33 }
 0x5d9   :  { %2370 = vperm.xlu0 %2771, %v2883_v31  }
 0x5da   :  { %2896 = vrcp.f32 %v2194_v49 }
 0x5db   :  { %v2885_v2 = vpop.eup %2884  ;;  %2898 = vrcp.f32 %v2197_v42 }
 0x5dc   :  { %v2887_v34 = vpop.eup %2886  ;;  %v2196_v51 = vadd.f32 1.0, %v2885_v2 }
 0x5dd   :  { %2373 = vperm.xlu1 %2770, %v2887_v34   ;;  %v2889_v5 = vpop.eup %2888 }
 0x5de   :  { %2900 = vrcp.f32 %v2196_v51 }
 0x5df   :  { %v2891_v3 = vpop.eup %2890 }
 0x5e0   :  { %v2893_v14 = vpop.eup %2892  ;;  %v2198_v27 = vadd.f32 1.0, %v2891_v3 }
 0x5e1   :  { %2376 = vperm.xlu0 %2771, %v2893_v14   ;;  %2379 = vperm.xlu1 %2770, %v2889_v5   ;;  %v2895_v18 = vpop.eup %2894 }
 0x5e2   :  { %2902 = vrcp.f32 %v2198_v27 }
 0x5e4   :  { %v2897_v53 = vpop.eup %2896 }
 0x5e5   :  { %2382 = vperm.xlu0 %2771, %v2897_v53   ;;  %2385 = vperm.xlu1 %2770, %v2895_v18   ;;  %v2899_v19 = vpop.eup %2898 }
 0x5e8   :  { %v2901_v32 = vpop.eup %2900 }
 0x5e9   :  { %2388 = vperm.xlu0 %2771, %v2901_v32   ;;  %2391 = vperm.xlu1 %2770, %v2899_v19  }
 0x5ec   :  { %v2903_v9 = vpop.eup %2902 }
 0x5ed   :  { %2394 = vperm.xlu0 %2771, %v2903_v9  }
 0x608   :  { %v2302_v11 = vpop.permute.xlu0 %2301 }
 0x609   :  { %v2399_v59 = vrot.slane %v2302_v11, %v4245_v37 }
 0x60c   :  { %v2305_v30 = vpop.permute.xlu1 %2304 }
 0x60d   :  { %v2403_v23 = vrot.slane %v2305_v30, %v4248_v62 }
 0x60f   :  { %v2404_v17 = vsel %vm1605_vm2, %v2403_v23, %v2399_v59 }
 0x610   :  { %v2308_v8 = vpop.permute.xlu1 %2307 }
 0x611   :  { %v2408_v57 = vrot.slane %v2308_v8, %v4245_v37 }
 0x614   :  { %v2311_v24 = vpop.permute.xlu0 %2310 }
 0x615   :  { %v2412_v15 = vrot.slane %v2311_v24, %v4248_v62 }
 0x617   :  { %v2413_v21 = vsel %vm1605_vm2, %v2412_v15, %v2408_v57 }
 0x618   :  { %v2314_v46 = vpop.permute.xlu1 %2313  ;;  %v2540_v36 = vsel %vm1742_vm3, %v2413_v21, %v2404_v17 }
 0x619   :  { %v2417_v22 = vrot.slane %v2314_v46, %v4245_v37 }
 0x61c   :  { %v2317_v26 = vpop.permute.xlu0 %2316 }
 0x61d   :  { %v2421_v10 = vrot.slane %v2317_v26, %v4248_v62 }
 0x61f   :  { %v2422_v4 = vsel %vm1605_vm2, %v2421_v10, %v2417_v22 }
 0x620   :  { %v2320_v45 = vpop.permute.xlu1 %2319  ;;  %v2541_v13 = vsel %vm1744_vm4, %v2422_v4, %v2540_v36 }
 0x621   :  { %v2426_v28 = vrot.slane %v2320_v45, %v4245_v37 }
 0x626   :  { %v2323_v20 = vpop.permute.xlu0 %2322 }
 0x627   :  { %v2430_v7 = vrot.slane %v2323_v20, %v4248_v62 }
 0x629   :  { %v2431_v60 = vsel %vm1605_vm2, %v2430_v7, %v2426_v28 }
 0x62a   :  { %v2326_v63 = vpop.permute.xlu1 %2325  ;;  %v2542_v58 = vsel %vm1746_vm5, %v2431_v60, %v2541_v13 }
 0x62b   :  { %v2435_v35 = vrot.slane %v2326_v63, %v4245_v37 }
 0x62e   :  { %v2329_v1 = vpop.permute.xlu0 %2328 }
 0x62f   :  { %v2439_v38 = vrot.slane %v2329_v1, %v4248_v62 }
 0x630   :  { %v2332_v47 = vpop.permute.xlu1 %2331 }
 0x631   :  { %v2444_v12 = vrot.slane %v2332_v47, %v4245_v37  ;;  %v2440_v43 = vsel %vm1605_vm2, %v2439_v38, %v2435_v35 }
 0x632   :  { %v2543_v6 = vsel %vm1748_vm6, %v2440_v43, %v2542_v58 }
 0x634   :  { %v2338_v40 = vpop.permute.xlu1 %2337  ;;  %v2335_v56 = vpop.permute.xlu0 %2334 }
 0x635   :  { %v2448_v39 = vrot.slane %v2335_v56, %v4248_v62  ;;  %v2453_v44 = vrot.slane %v2338_v40, %v4245_v37 }
 0x637   :  { %v2449_v48 = vsel %vm1605_vm2, %v2448_v39, %v2444_v12  ;;  %v2265_v39 = vadd.s32 8, %v3022_v16 }
 0x638   :  { %v2341_v41 = vpop.permute.xlu0 %2340  ;;  %v2344_v61 = vpop.permute.xlu1 %2343  ;;  %v2544_v55 = vsel %vm1750_vm7, %v2449_v48, %v2543_v6 }
 0x639   :  { %v2457_v52 = vrot.slane %v2341_v41, %v4248_v62  ;;  %v2462_v50 = vrot.slane %v2344_v61, %v4245_v37  ;;  %vm2267_vm12 = vcmp.eq.s32.totalorder %v2265_v39, %v4233_v25 }
 0x63b   :  { %v2458_v29 = vsel %vm1605_vm2, %v2457_v52, %v2453_v44 }
 0x63c   :  { %v2347_v54 = vpop.permute.xlu0 %2346  ;;  %v2545_v33 = vsel %vm1752_vm8, %v2458_v29, %v2544_v55 }
 0x63d   :  { %v2466_v0 = vrot.slane %v2347_v54, %v4248_v62 }
 0x63f   :  { %v2467_v31 = vsel %vm1605_vm2, %v2466_v0, %v2462_v50 }
 0x640   :  { %v2546_v49 = vsel %vm1754_vm9, %v2467_v31, %v2545_v33  ;;  %v2350_v2 = vpop.permute.xlu1 %2349 }
 0x641   :  { %v2556_v42 = vsel %vm2266_vm10, 0.0, %v2546_v49  ;;  %v2471_v63 = vrot.slane %v2350_v2, %v4245_v37 }
 0x642   :  { %2559 = vst.msk [vmem:[#allocation3] sm:$0xff] %vm2558_vm11, %v2556_v42 }
 0x644   :  { %v2353_v34 = vpop.permute.xlu0 %2352 }
 0x645   :  { %v2475_v46 = vrot.slane %v2353_v34, %v4248_v62 }
 0x647   :  { %v2476_v23 = vsel %vm1605_vm2, %v2475_v46, %v2471_v63 }
 0x648   :  { %v2356_v51 = vpop.permute.xlu1 %2355 }
 0x649   :  { %v2480_v26 = vrot.slane %v2356_v51, %v4245_v37 }
 0x64c   :  { %v2359_v5 = vpop.permute.xlu0 %2358 }
 0x64d   :  { %v2484_v9 = vrot.slane %v2359_v5, %v4248_v62 }
 0x64f   :  { %v2485_v1 = vsel %vm1605_vm2, %v2484_v9, %v2480_v26 }
 0x650   :  { %v2362_v3 = vpop.permute.xlu1 %2361  ;;  %v2365_v14 = vpop.permute.xlu0 %2364  ;;  %v2547_v38 = vsel %vm1742_vm3, %v2485_v1, %v2476_v23 }
 0x651   :  { %v2489_v30 = vrot.slane %v2362_v3, %v4245_v37  ;;  %v2493_v11 = vrot.slane %v2365_v14, %v4248_v62 }
 0x653   :  { %v2494_v10 = vsel %vm1605_vm2, %v2493_v11, %v2489_v30 }
 0x654   :  { %v2368_v27 = vpop.permute.xlu1 %2367  ;;  %v2548_v4 = vsel %vm1744_vm4, %v2494_v10, %v2547_v38 }
 0x655   :  { %v2498_v47 = vrot.slane %v2368_v27, %v4245_v37 }
 0x658   :  { %v2371_v18 = vpop.permute.xlu0 %2370 }
 0x659   :  { %v2502_v45 = vrot.slane %v2371_v18, %v4248_v62 }
 0x65b   :  { %v2503_v57 = vsel %vm1605_vm2, %v2502_v45, %v2498_v47 }
 0x65c   :  { %v2374_v53 = vpop.permute.xlu1 %2373  ;;  %v2549_v41 = vsel %vm1746_vm5, %v2503_v57, %v2548_v4 }
 0x65d   :  { %v2507_v40 = vrot.slane %v2374_v53, %v4245_v37 }
 0x660   :  { %v2380_v19 = vpop.permute.xlu1 %2379  ;;  %v2377_v32 = vpop.permute.xlu0 %2376 }
 0x661   :  { %v2511_v20 = vrot.slane %v2377_v32, %v4248_v62  ;;  %v2516_v7 = vrot.slane %v2380_v19, %v4245_v37 }
 0x663   :  { %v2512_v59 = vsel %vm1605_vm2, %v2511_v20, %v2507_v40 }
 0x664   :  { %v2386_v8 = vpop.permute.xlu1 %2385  ;;  %v2383_v24 = vpop.permute.xlu0 %2382  ;;  %v2550_v12 = vsel %vm1748_vm6, %v2512_v59, %v2549_v41 }
 0x665   :  { %v2520_v15 = vrot.slane %v2383_v24, %v4248_v62  ;;  %v2525_v21 = vrot.slane %v2386_v8, %v4245_v37 }
 0x667   :  { %v2521_v35 = vsel %vm1605_vm2, %v2520_v15, %v2516_v7 }
 0x668   :  { %v2389_v56 = vpop.permute.xlu0 %2388  ;;  %v2392_v28 = vpop.permute.xlu1 %2391  ;;  %v2551_v43 = vsel %vm1750_vm7, %v2521_v35, %v2550_v12 }
 0x669   :  { %v2529_v22 = vrot.slane %v2389_v56, %v4248_v62  ;;  %v2534_v52 = vrot.slane %v2392_v28, %v4245_v37 }
 0x66b   :  { %v2530_v17 = vsel %vm1605_vm2, %v2529_v22, %v2525_v21 }
 0x66c   :  { %v2395_v60 = vpop.permute.xlu0 %2394  ;;  %v2552_v16 = vsel %vm1752_vm8, %v2530_v17, %v2551_v43 }
 0x66d   :  { %v2538_v36 = vrot.slane %v2395_v60, %v4248_v62 }
 0x66f   :  { %v2539_v44 = vsel %vm1605_vm2, %v2538_v36, %v2534_v52 }
 0x670   :  { %v2553_v61 = vsel %vm1754_vm9, %v2539_v44, %v2552_v16 }
 0x671   :  { %v2557_v13 = vsel %vm2267_vm12, 0.0, %v2553_v61 }
 0x672   :  { %2560 = vst.msk [vmem:[#allocation3 + $0x8] sm:$0xff] %vm2558_vm11, %v2557_v13 }
 0x673   :  { %2915 = shalt.err (!%p2912_p4)
}
 0x674   :  { %s2916_s23 = scalar_lea.hbm %s4577_s11, 256 }
 0x675   :  { %p2917_p5 = scmp.ne.s32.totalorder %s4577_s11, %s2916_s23  ;;  %p2920_p6 = scmp.lt.u32.totalorder %s2916_s23, %s4577_s11 }
 0x677   :  { %p2922_p7 = pnand %p2920_p6, %p2917_p5 }
 0x679   :  { %2925 = shalt.err (!%p2922_p7)
}
 0x67a   :  { %s2932_s26 = smov 128   ;;  %s2933_s27 = smov 8  }
 0x67b   :  { %2572 = dma.vmem_to_hbm [thread:$0]  %s2567_s19, 256, %s4577_s11, [#allocation4], %s2932_s26, %s2932_s26, %s2933_s27  }
 0x67c   :  { %2926 = dma.done.wait [#allocation4], 256  }
 0x67d   :  { %2927 = vsyncadd [#allocation4], 4294967040 }
 0x67e   :  { %2576 = vsyncpa [#allocation4], 1 }

</bundles_post_ra>
